<compile_context>
chip_gen: v7x
topology: tpu7x:2x2x1
jax: 0.10.0
libtpu: 0.0.40
codegen_flags: <defaults>
</compile_context>

<pallas_src>
import functools

import jax
import jax.numpy as jnp
from jax.experimental import pallas as pl
from jax.experimental.pallas import tpu as pltpu

_EPS = 1e-5
_NEG_INF = -1e30  # finite sentinel keeps fully-masked rows NaN-free


# ---------------------------------------------------------------------------
# In-kernel helpers (operate on values, not refs)
# ---------------------------------------------------------------------------
def _bf16(x):
    return x.astype(jnp.bfloat16)


def _layer_norm(y, gamma, beta):
    mu = jnp.mean(y, axis=-1, keepdims=True)
    var = jnp.mean((y - mu) ** 2, axis=-1, keepdims=True)
    return (y - mu) * jax.lax.rsqrt(var + _EPS) * gamma + beta


def _mask_bias(mask_ref):
    """Additive attention bias (Lq, Lk): 0 where visible, -1e30 where masked.

    Accepts either an un-batched (Lq, Lk) ref (batch-invariant mask, constant
    index map) or a per-batch (1, Lq, Lk) block.
    """
    m = mask_ref[...] if len(mask_ref.shape) == 2 else mask_ref[0]
    return m.astype(jnp.float32) * _NEG_INF


def _attention(q, k, v, bias, residual, w_fc, b_fc, gamma, beta,
               *, n_head, d_k, d_v):
    """Heads-batched scaled-dot-product attention + output proj + add&norm.

    q: (Lq, H*d_k) (already pre-scaled by 1/sqrt(d_k) via packed weights)
    k: (Lk, H*d_k)   v: (Lk, H*d_v)   bias: (Lq, Lk) additive (0 / -1e30)
    Returns (out (Lq, Dm) f32, attn (H, Lq, Lk) f32).
    """
    lq, lk = q.shape[0], k.shape[0]
    # head-leading layout for the batched (leading-batch-dim) MXU contractions
    qh = q.reshape(lq, n_head, d_k).transpose(1, 0, 2)     # (H, Lq, d_k)
    kh = k.reshape(lk, n_head, d_k).transpose(1, 0, 2)     # (H, Lk, d_k)
    vh = v.reshape(lk, n_head, d_v).transpose(1, 0, 2)     # (H, Lk, d_v)

    scores = jax.lax.dot_general(                            # (H, Lq, Lk)
        _bf16(qh), _bf16(kh), (((2,), (2,)), ((0,), (0,))),
        preferred_element_type=jnp.float32)
    scores = scores + bias[None, :, :]                       # one broadcast add

    m = jnp.max(scores, axis=-1, keepdims=True)
    e = jnp.exp(scores - m)
    attn = e * pl.reciprocal(jnp.sum(e, axis=-1, keepdims=True), approx=True)

    out_h = jax.lax.dot_general(                             # (H, Lq, d_v)
        _bf16(attn), _bf16(vh), (((2,), (1,)), ((0,), (0,))),
        preferred_element_type=jnp.float32)

    # concat heads -> one deep (Lq, H*d_v) @ (H*d_v, Dm) output projection
    concat = out_h.transpose(1, 0, 2).reshape(lq, n_head * d_v)
    proj = jnp.dot(_bf16(concat), w_fc,
                   preferred_element_type=jnp.float32) + b_fc

    return _layer_norm(proj + residual, gamma, beta), attn


# ---------------------------------------------------------------------------
# Fused decoder-layer kernel: one batch element per grid step
# ---------------------------------------------------------------------------
def _decoder_layer_kernel(
        dec_ref, enc_ref, npm_ref, slf_mask_ref, enc_mask_ref,
        s_wqkv_ref, e_wq_ref, e_wkv_ref, s_wfc_ref, e_wfc_ref,
        f_w1_ref, f_w2_ref, bias_qkv_ref, bias_dm_ref, f_b1_ref,
        out_ref, slf_attn_ref, enc_attn_ref,
        *, n_head, d_k, d_v):
    x = dec_ref[0]                        # (Lq, Dm)  f32
    enc = enc_ref[0]                      # (Lk, Dm)  f32
    npm = npm_ref[0]                      # (Lq, 1)   f32
    slf_bias = _mask_bias(slf_mask_ref)   # (Lq, Lq)  additive
    enc_bias = _mask_bias(enc_mask_ref)   # (Lq, Lk)  additive

    bqkv = bias_qkv_ref[...]              # (2, 2*H*d_k + H*d_v) f32
    bdm = bias_dm_ref[...]                # (9, Dm)              f32
    hk = n_head * d_k

    # ---- self-attention sub-layer (fused QKV projection) ------------------
    qkv = jnp.dot(_bf16(x), s_wqkv_ref[...],
                  preferred_element_type=jnp.float32) + bqkv[0]
    y1, slf_attn = _attention(
        qkv[:, :hk], qkv[:, hk:2 * hk], qkv[:, 2 * hk:],
        slf_bias, x, s_wfc_ref[...], bdm[0], bdm[1], bdm[2],
        n_head=n_head, d_k=d_k, d_v=d_v)
    y1 = y1 * npm                         # non_pad_mask fused into epilogue

    # ---- encoder-decoder attention sub-layer (fused KV projection) --------
    q2 = jnp.dot(_bf16(y1), e_wq_ref[...],
                 preferred_element_type=jnp.float32) + bqkv[1, :hk]
    kv2 = jnp.dot(_bf16(enc), e_wkv_ref[...],
                  preferred_element_type=jnp.float32) + bqkv[1, hk:]
    y2, enc_attn = _attention(
        q2, kv2[:, :hk], kv2[:, hk:],
        enc_bias, y1, e_wfc_ref[...], bdm[3], bdm[4], bdm[5],
        n_head=n_head, d_k=d_k, d_v=d_v)
    y2 = y2 * npm

    # ---- position-wise feed-forward sub-layer ------------------------------
    h = jnp.dot(_bf16(y2), f_w1_ref[...],
                preferred_element_type=jnp.float32) + f_b1_ref[0]
    h = jnp.maximum(h, 0.0)               # ReLU
    y3 = jnp.dot(_bf16(h), f_w2_ref[...],
                 preferred_element_type=jnp.float32) + bdm[6]
    y3 = _layer_norm(y3 + y2, bdm[7], bdm[8]) * npm

    out_ref[0] = y3
    # Head-major attention maps written directly in their final layout.
    slf_attn_ref[...] = slf_attn[:, None].astype(slf_attn_ref.dtype)
    enc_attn_ref[...] = enc_attn[:, None].astype(enc_attn_ref.dtype)


# ---------------------------------------------------------------------------
# Wrapper: weight packing + pallas_call
# ---------------------------------------------------------------------------
def decoder_layer(dec_input, enc_output, non_pad_mask, slf_attn_mask,
                  dec_enc_attn_mask, params, *, n_head, d_k, d_v,
                  attn_dtype=jnp.float32):
    """Masks: 1.0 == masked; slf/dec_enc masks may be (Lq, Lk) or (B, Lq, Lk)."""
    B, Lq, Dm = dec_input.shape
    _, Lk, _ = enc_output.shape
    temperature = float(d_k) ** 0.5
    p_s, p_e, p_f = params["slf_attn"], params["enc_attn"], params["pos_ffn"]

    # Host-side packing: fuse Q/K/V weights, fold 1/sqrt(d_k) into Q, cast
    # matmul weights to bf16; biases / LN params stay f32 and are packed into
    # three arrays to cut per-step DMA descriptor count.
    s_wqkv = _bf16(jnp.concatenate(
        [p_s["w_q"] / temperature, p_s["w_k"], p_s["w_v"]], axis=1))
    e_wq = _bf16(p_e["w_q"] / temperature)
    e_wkv = _bf16(jnp.concatenate([p_e["w_k"], p_e["w_v"]], axis=1))

    bias_qkv = jnp.stack([
        jnp.concatenate([p_s["b_q"][0] / temperature, p_s["b_k"][0], p_s["b_v"][0]]),
        jnp.concatenate([p_e["b_q"][0] / temperature, p_e["b_k"][0], p_e["b_v"][0]]),
    ])                                                       # (2, 2*H*d_k + H*d_v)
    bias_dm = jnp.concatenate([                              # (9, Dm)
        p_s["b_fc"], p_s["ln_g"], p_s["ln_b"],
        p_e["b_fc"], p_e["ln_g"], p_e["ln_b"],
        p_f["b2"], p_f["ln_g"], p_f["ln_b"],
    ], axis=0)

    weights = (s_wqkv, e_wq, e_wkv,
               _bf16(p_s["w_fc"]), _bf16(p_e["w_fc"]),
               _bf16(p_f["w1"]), _bf16(p_f["w2"]),
               bias_qkv, bias_dm, p_f["b1"])

    def const_spec(a):                       # whole array, constant index map
        n = a.ndim
        return pl.BlockSpec(a.shape, lambda b, n=n: (0,) * n)

    def mask_spec(m):                        # batch-invariant masks not re-DMA'd
        if m.ndim == 2:
            return pl.BlockSpec(m.shape, lambda b: (0, 0))
        return pl.BlockSpec((1,) + tuple(m.shape[1:]), lambda b: (b, 0, 0))

    in_specs = [
        pl.BlockSpec((1, Lq, Dm), lambda b: (b, 0, 0)),
        pl.BlockSpec((1, Lk, Dm), lambda b: (b, 0, 0)),
        pl.BlockSpec((1, Lq, 1), lambda b: (b, 0, 0)),
        mask_spec(slf_attn_mask),
        mask_spec(dec_enc_attn_mask),
    ] + [const_spec(w) for w in weights]

    # Attention maps are produced head-major (H, B, Lq, Lk) directly by the
    # kernel; merging (H, B) -> (H*B) afterwards is a free leading-dim reshape.
    out_shape = (
        jax.ShapeDtypeStruct((B, Lq, Dm), jnp.float32),
        jax.ShapeDtypeStruct((n_head, B, Lq, Lq), attn_dtype),
        jax.ShapeDtypeStruct((n_head, B, Lq, Lk), attn_dtype),
    )
    out_specs = (
        pl.BlockSpec((1, Lq, Dm), lambda b: (b, 0, 0)),
        pl.BlockSpec((n_head, 1, Lq, Lq), lambda b: (0, b, 0, 0)),
        pl.BlockSpec((n_head, 1, Lq, Lk), lambda b: (0, b, 0, 0)),
    )

    kernel = functools.partial(_decoder_layer_kernel,
                               n_head=n_head, d_k=d_k, d_v=d_v)
    dec_out, slf_attn, enc_attn = pl.pallas_call(
        kernel,
        grid=(B,),
        in_specs=in_specs,
        out_specs=out_specs,
        out_shape=out_shape,
        compiler_params=pltpu.CompilerParams(
            dimension_semantics=("parallel",),      # 2 TCs on v7x; harmless elsewhere
            vmem_limit_bytes=32 * 1024 * 1024),     # above v5e's 16 MiB default
    )(dec_input, enc_output, non_pad_mask, slf_attn_mask, dec_enc_attn_mask,
      *weights)

    slf_attn = slf_attn.reshape(n_head * B, Lq, Lq)   # head-major, layout-free
    enc_attn = enc_attn.reshape(n_head * B, Lq, Lk)
    return dec_out, slf_attn, enc_attn


# ---------------------------------------------------------------------------
# Deterministic parameter init (shapes follow the PyTorch module __init__)
# ---------------------------------------------------------------------------
def init_params(key, d_model, d_inner, n_head, d_k, d_v):
    def nrm(k, shape, scale):
        return (scale * jax.random.normal(k, shape, jnp.float32)).astype(jnp.float32)

    def mha_params(k):
        ks = jax.random.split(k, 8)
        return dict(
            w_q=nrm(ks[0], (d_model, n_head * d_k), (2.0 / (d_model + d_k)) ** 0.5),
            b_q=nrm(ks[1], (1, n_head * d_k), 0.02),
            w_k=nrm(ks[2], (d_model, n_head * d_k), (2.0 / (d_model + d_k)) ** 0.5),
            b_k=nrm(ks[3], (1, n_head * d_k), 0.02),
            w_v=nrm(ks[4], (d_model, n_head * d_v), (2.0 / (d_model + d_v)) ** 0.5),
            b_v=nrm(ks[5], (1, n_head * d_v), 0.02),
            w_fc=nrm(ks[6], (n_head * d_v, d_model),
                     (2.0 / (n_head * d_v + d_model)) ** 0.5),
            b_fc=nrm(ks[7], (1, d_model), 0.02),
            ln_g=jnp.ones((1, d_model), jnp.float32),
            ln_b=jnp.zeros((1, d_model), jnp.float32),
        )

    k1, k2, k3 = jax.random.split(key, 3)
    ks = jax.random.split(k3, 4)
    ffn = dict(
        w1=nrm(ks[0], (d_model, d_inner), (2.0 / (d_model + d_inner)) ** 0.5),
        b1=nrm(ks[1], (1, d_inner), 0.02),
        w2=nrm(ks[2], (d_inner, d_model), (2.0 / (d_model + d_inner)) ** 0.5),
        b2=nrm(ks[3], (1, d_model), 0.02),
        ln_g=jnp.ones((1, d_model), jnp.float32),
        ln_b=jnp.zeros((1, d_model), jnp.float32),
    )
    return dict(slf_attn=mha_params(k1), enc_attn=mha_params(k2), pos_ffn=ffn)


# ---------------------------------------------------------------------------
if __name__ == "__main__":
    B, L_dec, L_enc = 2, 8, 16
    d_model, d_inner, n_head, d_k, d_v = 32, 64, 4, 8, 8

    key = jax.random.PRNGKey(0)
    kp, kd, ke = jax.random.split(key, 3)
    params = init_params(kp, d_model, d_inner, n_head, d_k, d_v)

    dec_input = jax.random.normal(kd, (B, L_dec, d_model), jnp.float32)
    enc_output = jax.random.normal(ke, (B, L_enc, d_model), jnp.float32)

    # self-attention mask: causal (1 == masked), batch-invariant -> pass 2D
    slf_attn_mask = jnp.triu(jnp.ones((L_dec, L_dec), jnp.float32), k=1)
    # decoder-encoder attention mask: batch 1 has last 4 encoder positions padded
    dec_enc_attn_mask = jnp.zeros((B, L_dec, L_enc), jnp.float32)
    dec_enc_attn_mask = dec_enc_attn_mask.at[1, :, L_enc - 4:].set(1.0)
    # non-pad mask: batch 1 has last 2 decoder positions padded
    non_pad_mask = jnp.ones((B, L_dec, 1), jnp.float32)
    non_pad_mask = non_pad_mask.at[1, L_dec - 2:, :].set(0.0)

    dec_out, slf_attn, enc_attn = decoder_layer(
        dec_input, enc_output, non_pad_mask, slf_attn_mask, dec_enc_attn_mask,
        params, n_head=n_head, d_k=d_k, d_v=d_v)

    jax.block_until_ready((dec_out, slf_attn, enc_attn))
    assert dec_out.shape == (B, L_dec, d_model)
    assert slf_attn.shape == (n_head * B, L_dec, L_dec)
    assert enc_attn.shape == (n_head * B, L_dec, L_enc)
    assert bool(jnp.isfinite(dec_out).all())
    print("KERNEL_OK")
</pallas_src>

<mosaic_0001>
module attributes {stable_mosaic.version = 11 : i64} {
  func.func @_decoder_layer_kernel(%arg0: i32, %arg1: memref<1x8x32xf32, #tpu.memory_space<vmem>>, %arg2: memref<1x16x32xf32, #tpu.memory_space<vmem>>, %arg3: memref<1x8x1xf32, #tpu.memory_space<vmem>>, %arg4: memref<8x8xf32, #tpu.memory_space<vmem>>, %arg5: memref<1x8x16xf32, #tpu.memory_space<vmem>>, %arg6: memref<32x96xbf16, #tpu.memory_space<vmem>>, %arg7: memref<32x32xbf16, #tpu.memory_space<vmem>>, %arg8: memref<32x64xbf16, #tpu.memory_space<vmem>>, %arg9: memref<32x32xbf16, #tpu.memory_space<vmem>>, %arg10: memref<32x32xbf16, #tpu.memory_space<vmem>>, %arg11: memref<32x64xbf16, #tpu.memory_space<vmem>>, %arg12: memref<64x32xbf16, #tpu.memory_space<vmem>>, %arg13: memref<2x96xf32, #tpu.memory_space<vmem>>, %arg14: memref<9x32xf32, #tpu.memory_space<vmem>>, %arg15: memref<1x64xf32, #tpu.memory_space<vmem>>, %arg16: memref<1x8x32xf32, #tpu.memory_space<vmem>>, %arg17: memref<4x1x8x8xf32, #tpu.memory_space<vmem>>, %arg18: memref<4x1x8x16xf32, #tpu.memory_space<vmem>>) attributes {dimension_semantics = [#tpu.dimension_semantics<parallel>], iteration_bounds = array<i64: 2>, scalar_prefetch = 0 : i64, scratch_operands = 0 : i64, tpu.core_type = #tpu.core_type<tc>, window_params = [{transform_indices = @transform_0, window_bounds = array<i64: 1, 8, 32>}, {transform_indices = @transform_1, window_bounds = array<i64: 1, 16, 32>}, {transform_indices = @transform_2, window_bounds = array<i64: 1, 8, 1>}, {pipeline_mode = #tpu.pipeline_mode<synchronous>, transform_indices = @transform_3, window_bounds = array<i64: 8, 8>}, {transform_indices = @transform_4, window_bounds = array<i64: 1, 8, 16>}, {pipeline_mode = #tpu.pipeline_mode<synchronous>, transform_indices = @transform_5, window_bounds = array<i64: 32, 96>}, {pipeline_mode = #tpu.pipeline_mode<synchronous>, transform_indices = @transform_6, window_bounds = array<i64: 32, 32>}, {pipeline_mode = #tpu.pipeline_mode<synchronous>, transform_indices = @transform_7, window_bounds = array<i64: 32, 64>}, {pipeline_mode = #tpu.pipeline_mode<synchronous>, transform_indices = @transform_8, window_bounds = array<i64: 32, 32>}, {pipeline_mode = #tpu.pipeline_mode<synchronous>, transform_indices = @transform_9, window_bounds = array<i64: 32, 32>}, {pipeline_mode = #tpu.pipeline_mode<synchronous>, transform_indices = @transform_10, window_bounds = array<i64: 32, 64>}, {pipeline_mode = #tpu.pipeline_mode<synchronous>, transform_indices = @transform_11, window_bounds = array<i64: 64, 32>}, {pipeline_mode = #tpu.pipeline_mode<synchronous>, transform_indices = @transform_12, window_bounds = array<i64: 2, 96>}, {pipeline_mode = #tpu.pipeline_mode<synchronous>, transform_indices = @transform_13, window_bounds = array<i64: 9, 32>}, {pipeline_mode = #tpu.pipeline_mode<synchronous>, transform_indices = @transform_14, window_bounds = array<i64: 1, 64>}, {transform_indices = @transform_15, window_bounds = array<i64: 1, 8, 32>}, {transform_indices = @transform_16, window_bounds = array<i64: 4, 1, 8, 8>}, {transform_indices = @transform_17, window_bounds = array<i64: 4, 1, 8, 16>}]} {
    %c0 = arith.constant 0 : index
    %c0_0 = arith.constant 0 : index
    %c0_1 = arith.constant 0 : index
    %0 = vector.load %arg1[%c0, %c0_0, %c0_1] : memref<1x8x32xf32, #tpu.memory_space<vmem>>, vector<1x8x32xf32>
    %1 = vector.shape_cast %0 : vector<1x8x32xf32> to vector<8x32xf32>
    %c0_2 = arith.constant 0 : index
    %c0_3 = arith.constant 0 : index
    %c0_4 = arith.constant 0 : index
    %2 = vector.load %arg2[%c0_2, %c0_3, %c0_4] : memref<1x16x32xf32, #tpu.memory_space<vmem>>, vector<1x16x32xf32>
    %3 = vector.shape_cast %2 : vector<1x16x32xf32> to vector<16x32xf32>
    %c0_5 = arith.constant 0 : index
    %c0_6 = arith.constant 0 : index
    %c0_7 = arith.constant 0 : index
    %4 = vector.load %arg3[%c0_5, %c0_6, %c0_7] : memref<1x8x1xf32, #tpu.memory_space<vmem>>, vector<1x8x1xf32>
    %5 = vector.shape_cast %4 : vector<1x8x1xf32> to vector<8x1xf32>
    %c0_8 = arith.constant 0 : index
    %c0_9 = arith.constant 0 : index
    %6 = vector.load %arg4[%c0_8, %c0_9] : memref<8x8xf32, #tpu.memory_space<vmem>>, vector<8x8xf32>
    %cst = arith.constant -1.000000e+30 : f32
    %7 = vector.broadcast %cst : f32 to vector<8x8xf32>
    %8 = arith.mulf %6, %7 : vector<8x8xf32>
    %c0_10 = arith.constant 0 : index
    %c0_11 = arith.constant 0 : index
    %c0_12 = arith.constant 0 : index
    %9 = vector.load %arg5[%c0_10, %c0_11, %c0_12] : memref<1x8x16xf32, #tpu.memory_space<vmem>>, vector<1x8x16xf32>
    %10 = vector.shape_cast %9 : vector<1x8x16xf32> to vector<8x16xf32>
    %cst_13 = arith.constant -1.000000e+30 : f32
    %11 = vector.broadcast %cst_13 : f32 to vector<8x16xf32>
    %12 = arith.mulf %10, %11 : vector<8x16xf32>
    %c0_14 = arith.constant 0 : index
    %c0_15 = arith.constant 0 : index
    %13 = vector.load %arg13[%c0_14, %c0_15] : memref<2x96xf32, #tpu.memory_space<vmem>>, vector<2x96xf32>
    %c0_16 = arith.constant 0 : index
    %c0_17 = arith.constant 0 : index
    %14 = vector.load %arg14[%c0_16, %c0_17] : memref<9x32xf32, #tpu.memory_space<vmem>>, vector<9x32xf32>
    %15 = arith.truncf %1 : vector<8x32xf32> to vector<8x32xbf16>
    %c0_18 = arith.constant 0 : index
    %c0_19 = arith.constant 0 : index
    %16 = vector.load %arg6[%c0_18, %c0_19] : memref<32x96xbf16, #tpu.memory_space<vmem>>, vector<32x96xbf16>
    %cst_20 = arith.constant dense<0.000000e+00> : vector<8x96xf32>
    %17 = tpu.matmul %15, %16, %cst_20 {dimension_numbers = #tpu.dot_dimension_numbers<[1], [0], [0], [1], [0, 0, 1, 1], [], []>} : vector<8x32xbf16>, vector<32x96xbf16>, vector<8x96xf32> -> vector<8x96xf32>
    %18 = vector.extract_strided_slice %13 {offsets = [0, 0], sizes = [1, 96], strides = [1, 1]} : vector<2x96xf32> to vector<1x96xf32>
    %19 = vector.shape_cast %18 : vector<1x96xf32> to vector<96xf32>
    %20 = vector.shape_cast %19 : vector<96xf32> to vector<1x96xf32>
    %21 = vector.broadcast %20 : vector<1x96xf32> to vector<8x96xf32>
    %22 = arith.addf %17, %21 : vector<8x96xf32>
    %23 = vector.extract_strided_slice %22 {offsets = [0, 0], sizes = [8, 32], strides = [1, 1]} : vector<8x96xf32> to vector<8x32xf32>
    %24 = vector.extract_strided_slice %22 {offsets = [0, 32], sizes = [8, 32], strides = [1, 1]} : vector<8x96xf32> to vector<8x32xf32>
    %25 = vector.extract_strided_slice %22 {offsets = [0, 64], sizes = [8, 32], strides = [1, 1]} : vector<8x96xf32> to vector<8x32xf32>
    %c0_21 = arith.constant 0 : index
    %c0_22 = arith.constant 0 : index
    %26 = vector.load %arg9[%c0_21, %c0_22] : memref<32x32xbf16, #tpu.memory_space<vmem>>, vector<32x32xbf16>
    %27 = vector.extract_strided_slice %14 {offsets = [0, 0], sizes = [1, 32], strides = [1, 1]} : vector<9x32xf32> to vector<1x32xf32>
    %28 = vector.shape_cast %27 : vector<1x32xf32> to vector<32xf32>
    %29 = vector.extract_strided_slice %14 {offsets = [1, 0], sizes = [1, 32], strides = [1, 1]} : vector<9x32xf32> to vector<1x32xf32>
    %30 = vector.shape_cast %29 : vector<1x32xf32> to vector<32xf32>
    %31 = vector.extract_strided_slice %14 {offsets = [2, 0], sizes = [1, 32], strides = [1, 1]} : vector<9x32xf32> to vector<1x32xf32>
    %32 = vector.shape_cast %31 : vector<1x32xf32> to vector<32xf32>
    %33 = vector.shape_cast %23 : vector<8x32xf32> to vector<8x4x8xf32>
    %34 = tpu.transpose %33, [1, 0, 2] : vector<8x4x8xf32> -> vector<4x8x8xf32>
    %35 = vector.shape_cast %24 : vector<8x32xf32> to vector<8x4x8xf32>
    %36 = tpu.transpose %35, [1, 0, 2] : vector<8x4x8xf32> -> vector<4x8x8xf32>
    %37 = vector.shape_cast %25 : vector<8x32xf32> to vector<8x4x8xf32>
    %38 = tpu.transpose %37, [1, 0, 2] : vector<8x4x8xf32> -> vector<4x8x8xf32>
    %39 = arith.truncf %34 : vector<4x8x8xf32> to vector<4x8x8xbf16>
    %40 = arith.truncf %36 : vector<4x8x8xf32> to vector<4x8x8xbf16>
    %cst_23 = arith.constant dense<0.000000e+00> : vector<4x8x8xf32>
    %41 = tpu.matmul %39, %40, %cst_23 {dimension_numbers = #tpu.dot_dimension_numbers<[2], [2], [1], [1], [0, 0, 0, 1, 1, 1], [0], [0]>} : vector<4x8x8xbf16>, vector<4x8x8xbf16>, vector<4x8x8xf32> -> vector<4x8x8xf32>
    %42 = vector.shape_cast %8 : vector<8x8xf32> to vector<1x8x8xf32>
    %43 = vector.broadcast %42 : vector<1x8x8xf32> to vector<4x8x8xf32>
    %44 = arith.addf %41, %43 : vector<4x8x8xf32>
    %cst_24 = arith.constant dense<0xFF800000> : vector<4x8xf32>
    %45 = vector.multi_reduction <maximumf>, %44, %cst_24 [2] : vector<4x8x8xf32> to vector<4x8xf32>
    %46 = vector.shape_cast %45 : vector<4x8xf32> to vector<4x8x1xf32>
    %47 = vector.broadcast %46 : vector<4x8x1xf32> to vector<4x8x8xf32>
    %48 = arith.subf %44, %47 : vector<4x8x8xf32>
    %49 = math.exp %48 : vector<4x8x8xf32>
    %cst_25 = arith.constant dense<0.000000e+00> : vector<4x8xf32>
    %50 = vector.multi_reduction <add>, %49, %cst_25 [2] : vector<4x8x8xf32> to vector<4x8xf32>
    %51 = vector.shape_cast %50 : vector<4x8xf32> to vector<4x8x1xf32>
    %52 = tpu.reciprocal %51 {approx = true} : vector<4x8x1xf32> -> vector<4x8x1xf32>
    %53 = vector.broadcast %52 : vector<4x8x1xf32> to vector<4x8x8xf32>
    %54 = arith.mulf %49, %53 : vector<4x8x8xf32>
    %55 = arith.truncf %54 : vector<4x8x8xf32> to vector<4x8x8xbf16>
    %56 = arith.truncf %38 : vector<4x8x8xf32> to vector<4x8x8xbf16>
    %cst_26 = arith.constant dense<0.000000e+00> : vector<4x8x8xf32>
    %57 = tpu.matmul %55, %56, %cst_26 {dimension_numbers = #tpu.dot_dimension_numbers<[2], [1], [1], [2], [0, 0, 0, 1, 1, 2], [0], [0]>} : vector<4x8x8xbf16>, vector<4x8x8xbf16>, vector<4x8x8xf32> -> vector<4x8x8xf32>
    %58 = tpu.transpose %57, [1, 0, 2] : vector<4x8x8xf32> -> vector<8x4x8xf32>
    %59 = vector.shape_cast %58 : vector<8x4x8xf32> to vector<8x32xf32>
    %60 = arith.truncf %59 : vector<8x32xf32> to vector<8x32xbf16>
    %cst_27 = arith.constant dense<0.000000e+00> : vector<8x32xf32>
    %61 = tpu.matmul %60, %26, %cst_27 {dimension_numbers = #tpu.dot_dimension_numbers<[1], [0], [0], [1], [0, 0, 1, 1], [], []>} : vector<8x32xbf16>, vector<32x32xbf16>, vector<8x32xf32> -> vector<8x32xf32>
    %62 = vector.shape_cast %28 : vector<32xf32> to vector<1x32xf32>
    %63 = vector.broadcast %62 : vector<1x32xf32> to vector<8x32xf32>
    %64 = arith.addf %61, %63 : vector<8x32xf32>
    %65 = arith.addf %64, %1 : vector<8x32xf32>
    %cst_28 = arith.constant dense<0.000000e+00> : vector<8xf32>
    %66 = vector.multi_reduction <add>, %65, %cst_28 [1] : vector<8x32xf32> to vector<8xf32>
    %67 = vector.shape_cast %66 : vector<8xf32> to vector<8x1xf32>
    %cst_29 = arith.constant 3.200000e+01 : f32
    %68 = vector.broadcast %cst_29 : f32 to vector<8x1xf32>
    %69 = arith.divf %67, %68 : vector<8x1xf32>
    %70 = vector.broadcast %69 : vector<8x1xf32> to vector<8x32xf32>
    %71 = arith.subf %65, %70 : vector<8x32xf32>
    %72 = arith.mulf %71, %71 : vector<8x32xf32>
    %cst_30 = arith.constant dense<0.000000e+00> : vector<8xf32>
    %73 = vector.multi_reduction <add>, %72, %cst_30 [1] : vector<8x32xf32> to vector<8xf32>
    %74 = vector.shape_cast %73 : vector<8xf32> to vector<8x1xf32>
    %cst_31 = arith.constant 3.200000e+01 : f32
    %75 = vector.broadcast %cst_31 : f32 to vector<8x1xf32>
    %76 = arith.divf %74, %75 : vector<8x1xf32>
    %77 = vector.broadcast %69 : vector<8x1xf32> to vector<8x32xf32>
    %78 = arith.subf %65, %77 : vector<8x32xf32>
    %cst_32 = arith.constant 9.99999974E-6 : f32
    %79 = vector.broadcast %cst_32 : f32 to vector<8x1xf32>
    %80 = arith.addf %76, %79 : vector<8x1xf32>
    %81 = math.rsqrt %80 : vector<8x1xf32>
    %82 = vector.broadcast %81 : vector<8x1xf32> to vector<8x32xf32>
    %83 = arith.mulf %78, %82 : vector<8x32xf32>
    %84 = vector.shape_cast %30 : vector<32xf32> to vector<1x32xf32>
    %85 = vector.broadcast %84 : vector<1x32xf32> to vector<8x32xf32>
    %86 = arith.mulf %83, %85 : vector<8x32xf32>
    %87 = vector.shape_cast %32 : vector<32xf32> to vector<1x32xf32>
    %88 = vector.broadcast %87 : vector<1x32xf32> to vector<8x32xf32>
    %89 = arith.addf %86, %88 : vector<8x32xf32>
    %90 = vector.broadcast %5 : vector<8x1xf32> to vector<8x32xf32>
    %91 = arith.mulf %89, %90 : vector<8x32xf32>
    %92 = arith.truncf %91 : vector<8x32xf32> to vector<8x32xbf16>
    %c0_33 = arith.constant 0 : index
    %c0_34 = arith.constant 0 : index
    %93 = vector.load %arg7[%c0_33, %c0_34] : memref<32x32xbf16, #tpu.memory_space<vmem>>, vector<32x32xbf16>
    %cst_35 = arith.constant dense<0.000000e+00> : vector<8x32xf32>
    %94 = tpu.matmul %92, %93, %cst_35 {dimension_numbers = #tpu.dot_dimension_numbers<[1], [0], [0], [1], [0, 0, 1, 1], [], []>} : vector<8x32xbf16>, vector<32x32xbf16>, vector<8x32xf32> -> vector<8x32xf32>
    %95 = vector.extract_strided_slice %13 {offsets = [1, 0], sizes = [1, 32], strides = [1, 1]} : vector<2x96xf32> to vector<1x32xf32>
    %96 = vector.shape_cast %95 : vector<1x32xf32> to vector<32xf32>
    %97 = vector.shape_cast %96 : vector<32xf32> to vector<1x32xf32>
    %98 = vector.broadcast %97 : vector<1x32xf32> to vector<8x32xf32>
    %99 = arith.addf %94, %98 : vector<8x32xf32>
    %100 = arith.truncf %3 : vector<16x32xf32> to vector<16x32xbf16>
    %c0_36 = arith.constant 0 : index
    %c0_37 = arith.constant 0 : index
    %101 = vector.load %arg8[%c0_36, %c0_37] : memref<32x64xbf16, #tpu.memory_space<vmem>>, vector<32x64xbf16>
    %cst_38 = arith.constant dense<0.000000e+00> : vector<16x64xf32>
    %102 = tpu.matmul %100, %101, %cst_38 {dimension_numbers = #tpu.dot_dimension_numbers<[1], [0], [0], [1], [0, 0, 1, 1], [], []>} : vector<16x32xbf16>, vector<32x64xbf16>, vector<16x64xf32> -> vector<16x64xf32>
    %103 = vector.extract_strided_slice %13 {offsets = [1, 32], sizes = [1, 64], strides = [1, 1]} : vector<2x96xf32> to vector<1x64xf32>
    %104 = vector.shape_cast %103 : vector<1x64xf32> to vector<64xf32>
    %105 = vector.shape_cast %104 : vector<64xf32> to vector<1x64xf32>
    %106 = vector.broadcast %105 : vector<1x64xf32> to vector<16x64xf32>
    %107 = arith.addf %102, %106 : vector<16x64xf32>
    %108 = vector.extract_strided_slice %107 {offsets = [0, 0], sizes = [16, 32], strides = [1, 1]} : vector<16x64xf32> to vector<16x32xf32>
    %109 = vector.extract_strided_slice %107 {offsets = [0, 32], sizes = [16, 32], strides = [1, 1]} : vector<16x64xf32> to vector<16x32xf32>
    %c0_39 = arith.constant 0 : index
    %c0_40 = arith.constant 0 : index
    %110 = vector.load %arg10[%c0_39, %c0_40] : memref<32x32xbf16, #tpu.memory_space<vmem>>, vector<32x32xbf16>
    %111 = vector.extract_strided_slice %14 {offsets = [3, 0], sizes = [1, 32], strides = [1, 1]} : vector<9x32xf32> to vector<1x32xf32>
    %112 = vector.shape_cast %111 : vector<1x32xf32> to vector<32xf32>
    %113 = vector.extract_strided_slice %14 {offsets = [4, 0], sizes = [1, 32], strides = [1, 1]} : vector<9x32xf32> to vector<1x32xf32>
    %114 = vector.shape_cast %113 : vector<1x32xf32> to vector<32xf32>
    %115 = vector.extract_strided_slice %14 {offsets = [5, 0], sizes = [1, 32], strides = [1, 1]} : vector<9x32xf32> to vector<1x32xf32>
    %116 = vector.shape_cast %115 : vector<1x32xf32> to vector<32xf32>
    %117 = vector.shape_cast %99 : vector<8x32xf32> to vector<8x4x8xf32>
    %118 = tpu.transpose %117, [1, 0, 2] : vector<8x4x8xf32> -> vector<4x8x8xf32>
    %119 = vector.shape_cast %108 : vector<16x32xf32> to vector<16x4x8xf32>
    %120 = tpu.transpose %119, [1, 0, 2] : vector<16x4x8xf32> -> vector<4x16x8xf32>
    %121 = vector.shape_cast %109 : vector<16x32xf32> to vector<16x4x8xf32>
    %122 = tpu.transpose %121, [1, 0, 2] : vector<16x4x8xf32> -> vector<4x16x8xf32>
    %123 = arith.truncf %118 : vector<4x8x8xf32> to vector<4x8x8xbf16>
    %124 = arith.truncf %120 : vector<4x16x8xf32> to vector<4x16x8xbf16>
    %cst_41 = arith.constant dense<0.000000e+00> : vector<4x8x16xf32>
    %125 = tpu.matmul %123, %124, %cst_41 {dimension_numbers = #tpu.dot_dimension_numbers<[2], [2], [1], [1], [0, 0, 0, 1, 1, 1], [0], [0]>} : vector<4x8x8xbf16>, vector<4x16x8xbf16>, vector<4x8x16xf32> -> vector<4x8x16xf32>
    %126 = vector.shape_cast %12 : vector<8x16xf32> to vector<1x8x16xf32>
    %127 = vector.broadcast %126 : vector<1x8x16xf32> to vector<4x8x16xf32>
    %128 = arith.addf %125, %127 : vector<4x8x16xf32>
    %cst_42 = arith.constant dense<0xFF800000> : vector<4x8xf32>
    %129 = vector.multi_reduction <maximumf>, %128, %cst_42 [2] : vector<4x8x16xf32> to vector<4x8xf32>
    %130 = vector.shape_cast %129 : vector<4x8xf32> to vector<4x8x1xf32>
    %131 = vector.broadcast %130 : vector<4x8x1xf32> to vector<4x8x16xf32>
    %132 = arith.subf %128, %131 : vector<4x8x16xf32>
    %133 = math.exp %132 : vector<4x8x16xf32>
    %cst_43 = arith.constant dense<0.000000e+00> : vector<4x8xf32>
    %134 = vector.multi_reduction <add>, %133, %cst_43 [2] : vector<4x8x16xf32> to vector<4x8xf32>
    %135 = vector.shape_cast %134 : vector<4x8xf32> to vector<4x8x1xf32>
    %136 = tpu.reciprocal %135 {approx = true} : vector<4x8x1xf32> -> vector<4x8x1xf32>
    %137 = vector.broadcast %136 : vector<4x8x1xf32> to vector<4x8x16xf32>
    %138 = arith.mulf %133, %137 : vector<4x8x16xf32>
    %139 = arith.truncf %138 : vector<4x8x16xf32> to vector<4x8x16xbf16>
    %140 = arith.truncf %122 : vector<4x16x8xf32> to vector<4x16x8xbf16>
    %cst_44 = arith.constant dense<0.000000e+00> : vector<4x8x8xf32>
    %141 = tpu.matmul %139, %140, %cst_44 {dimension_numbers = #tpu.dot_dimension_numbers<[2], [1], [1], [2], [0, 0, 0, 1, 1, 2], [0], [0]>} : vector<4x8x16xbf16>, vector<4x16x8xbf16>, vector<4x8x8xf32> -> vector<4x8x8xf32>
    %142 = tpu.transpose %141, [1, 0, 2] : vector<4x8x8xf32> -> vector<8x4x8xf32>
    %143 = vector.shape_cast %142 : vector<8x4x8xf32> to vector<8x32xf32>
    %144 = arith.truncf %143 : vector<8x32xf32> to vector<8x32xbf16>
    %cst_45 = arith.constant dense<0.000000e+00> : vector<8x32xf32>
    %145 = tpu.matmul %144, %110, %cst_45 {dimension_numbers = #tpu.dot_dimension_numbers<[1], [0], [0], [1], [0, 0, 1, 1], [], []>} : vector<8x32xbf16>, vector<32x32xbf16>, vector<8x32xf32> -> vector<8x32xf32>
    %146 = vector.shape_cast %112 : vector<32xf32> to vector<1x32xf32>
    %147 = vector.broadcast %146 : vector<1x32xf32> to vector<8x32xf32>
    %148 = arith.addf %145, %147 : vector<8x32xf32>
    %149 = arith.addf %148, %91 : vector<8x32xf32>
    %cst_46 = arith.constant dense<0.000000e+00> : vector<8xf32>
    %150 = vector.multi_reduction <add>, %149, %cst_46 [1] : vector<8x32xf32> to vector<8xf32>
    %151 = vector.shape_cast %150 : vector<8xf32> to vector<8x1xf32>
    %cst_47 = arith.constant 3.200000e+01 : f32
    %152 = vector.broadcast %cst_47 : f32 to vector<8x1xf32>
    %153 = arith.divf %151, %152 : vector<8x1xf32>
    %154 = vector.broadcast %153 : vector<8x1xf32> to vector<8x32xf32>
    %155 = arith.subf %149, %154 : vector<8x32xf32>
    %156 = arith.mulf %155, %155 : vector<8x32xf32>
    %cst_48 = arith.constant dense<0.000000e+00> : vector<8xf32>
    %157 = vector.multi_reduction <add>, %156, %cst_48 [1] : vector<8x32xf32> to vector<8xf32>
    %158 = vector.shape_cast %157 : vector<8xf32> to vector<8x1xf32>
    %cst_49 = arith.constant 3.200000e+01 : f32
    %159 = vector.broadcast %cst_49 : f32 to vector<8x1xf32>
    %160 = arith.divf %158, %159 : vector<8x1xf32>
    %161 = vector.broadcast %153 : vector<8x1xf32> to vector<8x32xf32>
    %162 = arith.subf %149, %161 : vector<8x32xf32>
    %cst_50 = arith.constant 9.99999974E-6 : f32
    %163 = vector.broadcast %cst_50 : f32 to vector<8x1xf32>
    %164 = arith.addf %160, %163 : vector<8x1xf32>
    %165 = math.rsqrt %164 : vector<8x1xf32>
    %166 = vector.broadcast %165 : vector<8x1xf32> to vector<8x32xf32>
    %167 = arith.mulf %162, %166 : vector<8x32xf32>
    %168 = vector.shape_cast %114 : vector<32xf32> to vector<1x32xf32>
    %169 = vector.broadcast %168 : vector<1x32xf32> to vector<8x32xf32>
    %170 = arith.mulf %167, %169 : vector<8x32xf32>
    %171 = vector.shape_cast %116 : vector<32xf32> to vector<1x32xf32>
    %172 = vector.broadcast %171 : vector<1x32xf32> to vector<8x32xf32>
    %173 = arith.addf %170, %172 : vector<8x32xf32>
    %174 = vector.broadcast %5 : vector<8x1xf32> to vector<8x32xf32>
    %175 = arith.mulf %173, %174 : vector<8x32xf32>
    %176 = arith.truncf %175 : vector<8x32xf32> to vector<8x32xbf16>
    %c0_51 = arith.constant 0 : index
    %c0_52 = arith.constant 0 : index
    %177 = vector.load %arg11[%c0_51, %c0_52] : memref<32x64xbf16, #tpu.memory_space<vmem>>, vector<32x64xbf16>
    %cst_53 = arith.constant dense<0.000000e+00> : vector<8x64xf32>
    %178 = tpu.matmul %176, %177, %cst_53 {dimension_numbers = #tpu.dot_dimension_numbers<[1], [0], [0], [1], [0, 0, 1, 1], [], []>} : vector<8x32xbf16>, vector<32x64xbf16>, vector<8x64xf32> -> vector<8x64xf32>
    %c0_54 = arith.constant 0 : index
    %c0_55 = arith.constant 0 : index
    %179 = vector.load %arg15[%c0_54, %c0_55] : memref<1x64xf32, #tpu.memory_space<vmem>>, vector<1x64xf32>
    %180 = vector.shape_cast %179 : vector<1x64xf32> to vector<64xf32>
    %181 = vector.shape_cast %180 : vector<64xf32> to vector<1x64xf32>
    %182 = vector.broadcast %181 : vector<1x64xf32> to vector<8x64xf32>
    %183 = arith.addf %178, %182 : vector<8x64xf32>
    %cst_56 = arith.constant 0.000000e+00 : f32
    %184 = vector.broadcast %cst_56 : f32 to vector<8x64xf32>
    %185 = arith.maximumf %183, %184 : vector<8x64xf32>
    %186 = arith.truncf %185 : vector<8x64xf32> to vector<8x64xbf16>
    %c0_57 = arith.constant 0 : index
    %c0_58 = arith.constant 0 : index
    %187 = vector.load %arg12[%c0_57, %c0_58] : memref<64x32xbf16, #tpu.memory_space<vmem>>, vector<64x32xbf16>
    %cst_59 = arith.constant dense<0.000000e+00> : vector<8x32xf32>
    %188 = tpu.matmul %186, %187, %cst_59 {dimension_numbers = #tpu.dot_dimension_numbers<[1], [0], [0], [1], [0, 0, 1, 1], [], []>} : vector<8x64xbf16>, vector<64x32xbf16>, vector<8x32xf32> -> vector<8x32xf32>
    %189 = vector.extract_strided_slice %14 {offsets = [6, 0], sizes = [1, 32], strides = [1, 1]} : vector<9x32xf32> to vector<1x32xf32>
    %190 = vector.shape_cast %189 : vector<1x32xf32> to vector<32xf32>
    %191 = vector.shape_cast %190 : vector<32xf32> to vector<1x32xf32>
    %192 = vector.broadcast %191 : vector<1x32xf32> to vector<8x32xf32>
    %193 = arith.addf %188, %192 : vector<8x32xf32>
    %194 = arith.addf %193, %175 : vector<8x32xf32>
    %195 = vector.extract_strided_slice %14 {offsets = [7, 0], sizes = [1, 32], strides = [1, 1]} : vector<9x32xf32> to vector<1x32xf32>
    %196 = vector.shape_cast %195 : vector<1x32xf32> to vector<32xf32>
    %197 = vector.extract_strided_slice %14 {offsets = [8, 0], sizes = [1, 32], strides = [1, 1]} : vector<9x32xf32> to vector<1x32xf32>
    %198 = vector.shape_cast %197 : vector<1x32xf32> to vector<32xf32>
    %cst_60 = arith.constant dense<0.000000e+00> : vector<8xf32>
    %199 = vector.multi_reduction <add>, %194, %cst_60 [1] : vector<8x32xf32> to vector<8xf32>
    %200 = vector.shape_cast %199 : vector<8xf32> to vector<8x1xf32>
    %cst_61 = arith.constant 3.200000e+01 : f32
    %201 = vector.broadcast %cst_61 : f32 to vector<8x1xf32>
    %202 = arith.divf %200, %201 : vector<8x1xf32>
    %203 = vector.broadcast %202 : vector<8x1xf32> to vector<8x32xf32>
    %204 = arith.subf %194, %203 : vector<8x32xf32>
    %205 = arith.mulf %204, %204 : vector<8x32xf32>
    %cst_62 = arith.constant dense<0.000000e+00> : vector<8xf32>
    %206 = vector.multi_reduction <add>, %205, %cst_62 [1] : vector<8x32xf32> to vector<8xf32>
    %207 = vector.shape_cast %206 : vector<8xf32> to vector<8x1xf32>
    %cst_63 = arith.constant 3.200000e+01 : f32
    %208 = vector.broadcast %cst_63 : f32 to vector<8x1xf32>
    %209 = arith.divf %207, %208 : vector<8x1xf32>
    %210 = vector.broadcast %202 : vector<8x1xf32> to vector<8x32xf32>
    %211 = arith.subf %194, %210 : vector<8x32xf32>
    %cst_64 = arith.constant 9.99999974E-6 : f32
    %212 = vector.broadcast %cst_64 : f32 to vector<8x1xf32>
    %213 = arith.addf %209, %212 : vector<8x1xf32>
    %214 = math.rsqrt %213 : vector<8x1xf32>
    %215 = vector.broadcast %214 : vector<8x1xf32> to vector<8x32xf32>
    %216 = arith.mulf %211, %215 : vector<8x32xf32>
    %217 = vector.shape_cast %196 : vector<32xf32> to vector<1x32xf32>
    %218 = vector.broadcast %217 : vector<1x32xf32> to vector<8x32xf32>
    %219 = arith.mulf %216, %218 : vector<8x32xf32>
    %220 = vector.shape_cast %198 : vector<32xf32> to vector<1x32xf32>
    %221 = vector.broadcast %220 : vector<1x32xf32> to vector<8x32xf32>
    %222 = arith.addf %219, %221 : vector<8x32xf32>
    %223 = vector.broadcast %5 : vector<8x1xf32> to vector<8x32xf32>
    %224 = arith.mulf %222, %223 : vector<8x32xf32>
    %c0_65 = arith.constant 0 : index
    %c0_66 = arith.constant 0 : index
    %c0_67 = arith.constant 0 : index
    %225 = vector.load %arg16[%c0_65, %c0_66, %c0_67] : memref<1x8x32xf32, #tpu.memory_space<vmem>>, vector<1x8x32xf32>
    %226 = vector.shape_cast %225 : vector<1x8x32xf32> to vector<8x32xf32>
    %227 = vector.shape_cast %224 : vector<8x32xf32> to vector<1x8x32xf32>
    tpu.vector_store %arg16[%c0_65, %c0_66, %c0_67], %227 {strides = array<i32>} : memref<1x8x32xf32, #tpu.memory_space<vmem>>, vector<1x8x32xf32>,
    %228 = vector.shape_cast %54 : vector<4x8x8xf32> to vector<4x1x8x8xf32>
    %c0_68 = arith.constant 0 : index
    %c0_69 = arith.constant 0 : index
    %c0_70 = arith.constant 0 : index
    %c0_71 = arith.constant 0 : index
    %229 = vector.load %arg17[%c0_68, %c0_69, %c0_70, %c0_71] : memref<4x1x8x8xf32, #tpu.memory_space<vmem>>, vector<4x1x8x8xf32>
    tpu.vector_store %arg17[%c0_68, %c0_69, %c0_70, %c0_71], %228 {strides = array<i32>} : memref<4x1x8x8xf32, #tpu.memory_space<vmem>>, vector<4x1x8x8xf32>,
    %230 = vector.shape_cast %138 : vector<4x8x16xf32> to vector<4x1x8x16xf32>
    %c0_72 = arith.constant 0 : index
    %c0_73 = arith.constant 0 : index
    %c0_74 = arith.constant 0 : index
    %c0_75 = arith.constant 0 : index
    %231 = vector.load %arg18[%c0_72, %c0_73, %c0_74, %c0_75] : memref<4x1x8x16xf32, #tpu.memory_space<vmem>>, vector<4x1x8x16xf32>
    tpu.vector_store %arg18[%c0_72, %c0_73, %c0_74, %c0_75], %230 {strides = array<i32>} : memref<4x1x8x16xf32, #tpu.memory_space<vmem>>, vector<4x1x8x16xf32>,
    return
  }
  func.func @transform_0(%arg0: i32) -> (i32, i32, i32) {
    %c0_i32 = arith.constant 0 : i32
    %c0_i32_0 = arith.constant 0 : i32
    %c0_i32_1 = arith.constant 0 : i32
    return %arg0, %c0_i32, %c0_i32_0 : i32, i32, i32
  }
  func.func @transform_1(%arg0: i32) -> (i32, i32, i32) {
    %c0_i32 = arith.constant 0 : i32
    %c0_i32_0 = arith.constant 0 : i32
    %c0_i32_1 = arith.constant 0 : i32
    return %arg0, %c0_i32, %c0_i32_0 : i32, i32, i32
  }
  func.func @transform_2(%arg0: i32) -> (i32, i32, i32) {
    %c0_i32 = arith.constant 0 : i32
    %c0_i32_0 = arith.constant 0 : i32
    %c0_i32_1 = arith.constant 0 : i32
    return %arg0, %c0_i32, %c0_i32_0 : i32, i32, i32
  }
  func.func @transform_3(%arg0: i32) -> (i32, i32) {
    %c0_i32 = arith.constant 0 : i32
    %c0_i32_0 = arith.constant 0 : i32
    %c0_i32_1 = arith.constant 0 : i32
    return %c0_i32, %c0_i32_0 : i32, i32
  }
  func.func @transform_4(%arg0: i32) -> (i32, i32, i32) {
    %c0_i32 = arith.constant 0 : i32
    %c0_i32_0 = arith.constant 0 : i32
    %c0_i32_1 = arith.constant 0 : i32
    return %arg0, %c0_i32, %c0_i32_0 : i32, i32, i32
  }
  func.func @transform_5(%arg0: i32) -> (i32, i32) {
    %c0_i32 = arith.constant 0 : i32
    %c0_i32_0 = arith.constant 0 : i32
    %c0_i32_1 = arith.constant 0 : i32
    return %c0_i32, %c0_i32_0 : i32, i32
  }
  func.func @transform_6(%arg0: i32) -> (i32, i32) {
    %c0_i32 = arith.constant 0 : i32
    %c0_i32_0 = arith.constant 0 : i32
    %c0_i32_1 = arith.constant 0 : i32
    return %c0_i32, %c0_i32_0 : i32, i32
  }
  func.func @transform_7(%arg0: i32) -> (i32, i32) {
    %c0_i32 = arith.constant 0 : i32
    %c0_i32_0 = arith.constant 0 : i32
    %c0_i32_1 = arith.constant 0 : i32
    return %c0_i32, %c0_i32_0 : i32, i32
  }
  func.func @transform_8(%arg0: i32) -> (i32, i32) {
    %c0_i32 = arith.constant 0 : i32
    %c0_i32_0 = arith.constant 0 : i32
    %c0_i32_1 = arith.constant 0 : i32
    return %c0_i32, %c0_i32_0 : i32, i32
  }
  func.func @transform_9(%arg0: i32) -> (i32, i32) {
    %c0_i32 = arith.constant 0 : i32
    %c0_i32_0 = arith.constant 0 : i32
    %c0_i32_1 = arith.constant 0 : i32
    return %c0_i32, %c0_i32_0 : i32, i32
  }
  func.func @transform_10(%arg0: i32) -> (i32, i32) {
    %c0_i32 = arith.constant 0 : i32
    %c0_i32_0 = arith.constant 0 : i32
    %c0_i32_1 = arith.constant 0 : i32
    return %c0_i32, %c0_i32_0 : i32, i32
  }
  func.func @transform_11(%arg0: i32) -> (i32, i32) {
    %c0_i32 = arith.constant 0 : i32
    %c0_i32_0 = arith.constant 0 : i32
    %c0_i32_1 = arith.constant 0 : i32
    return %c0_i32, %c0_i32_0 : i32, i32
  }
  func.func @transform_12(%arg0: i32) -> (i32, i32) {
    %c0_i32 = arith.constant 0 : i32
    %c0_i32_0 = arith.constant 0 : i32
    %c0_i32_1 = arith.constant 0 : i32
    return %c0_i32, %c0_i32_0 : i32, i32
  }
  func.func @transform_13(%arg0: i32) -> (i32, i32) {
    %c0_i32 = arith.constant 0 : i32
    %c0_i32_0 = arith.constant 0 : i32
    %c0_i32_1 = arith.constant 0 : i32
    return %c0_i32, %c0_i32_0 : i32, i32
  }
  func.func @transform_14(%arg0: i32) -> (i32, i32) {
    %c0_i32 = arith.constant 0 : i32
    %c0_i32_0 = arith.constant 0 : i32
    %c0_i32_1 = arith.constant 0 : i32
    return %c0_i32, %c0_i32_0 : i32, i32
  }
  func.func @transform_15(%arg0: i32) -> (i32, i32, i32) {
    %c0_i32 = arith.constant 0 : i32
    %c0_i32_0 = arith.constant 0 : i32
    %c0_i32_1 = arith.constant 0 : i32
    return %arg0, %c0_i32, %c0_i32_0 : i32, i32, i32
  }
  func.func @transform_16(%arg0: i32) -> (i32, i32, i32, i32) {
    %c0_i32 = arith.constant 0 : i32
    %c0_i32_0 = arith.constant 0 : i32
    %c0_i32_1 = arith.constant 0 : i32
    %c0_i32_2 = arith.constant 0 : i32
    return %c0_i32, %arg0, %c0_i32_0, %c0_i32_1 : i32, i32, i32, i32
  }
  func.func @transform_17(%arg0: i32) -> (i32, i32, i32, i32) {
    %c0_i32 = arith.constant 0 : i32
    %c0_i32_0 = arith.constant 0 : i32
    %c0_i32_1 = arith.constant 0 : i32
    %c0_i32_2 = arith.constant 0 : i32
    return %c0_i32, %arg0, %c0_i32_0, %c0_i32_1 : i32, i32, i32, i32
  }
}

</mosaic_0001>

<bundles_post_ra>
// kernel: tpu_custom_call.1
= control target key start
LH: loop header
LB: loop body
LE: loop exit
PB: predicated region body
PF: predicated region fallthrough
CT: control target
= control target key end

     0   :  { %s5705_s0 = inlined_call_operand.vmem [shape: f32[2,8,32], index: 0, kind: input, shape index: {}]   ;;  %s5706_s1 = inlined_call_operand.vmem [shape: f32[2,16,32], index: 1, kind: input, shape index: {}]   ;;  %s5707_s2 = inlined_call_operand.vmem [shape: f32[2,8,1], index: 2, kind: input, shape index: {}]   ;;  %s5708_s3 = inlined_call_operand.hbm [shape: f32[8,8], index: 3, kind: input, shape index: {}]   ;;  %s5709_s4 = inlined_call_operand.vmem [shape: f32[2,8,16], index: 4, kind: input, shape index: {}]   ;;  %s5710_s5 = inlined_call_operand.hbm [shape: bf16[32,96], index: 5, kind: input, shape index: {}]   ;;  %s5711_s6 = inlined_call_operand.hbm [shape: bf16[32,32], index: 6, kind: input, shape index: {}]   ;;  %s5712_s7 = inlined_call_operand.hbm [shape: bf16[32,64], index: 7, kind: input, shape index: {}]   ;;  %s5713_s8 = inlined_call_operand.vmem [shape: bf16[32,32], index: 8, kind: input, shape index: {}]   ;;  %s5714_s9 = inlined_call_operand.hbm [shape: bf16[32,32], index: 9, kind: input, shape index: {}]   ;;  %s5715_s10 = inlined_call_operand.hbm [shape: bf16[32,64], index: 10, kind: input, shape index: {}]   ;;  %s5716_s11 = inlined_call_operand.vmem [shape: bf16[64,32], index: 11, kind: input, shape index: {}]   ;;  %s5717_s12 = inlined_call_operand.vmem [shape: f32[2,96], index: 12, kind: input, shape index: {}]   ;;  %s5718_s13 = inlined_call_operand.vmem [shape: f32[9,32], index: 13, kind: input, shape index: {}]   ;;  %s5719_s14 = inlined_call_operand.vmem [shape: f32[1,64], index: 14, kind: input, shape index: {}]   ;;  %s5720_s15 = inlined_call_operand.hbm [shape: f32[2,8,32], index: 15, kind: output, shape index: {0}]   ;;  %s5721_s16 = inlined_call_operand.hbm [shape: f32[4,2,8,8], index: 16, kind: output, shape index: {1}]   ;;  %s5722_s17 = inlined_call_operand.hbm [shape: f32[4,2,8,16], index: 17, kind: output, shape index: {2}]  }
   0x1   :  { %5745 = sst [smem:[#allocation30_spill]] %s5705_s0 }
   0x2   :  { %5746 = sst [smem:[#allocation31_spill]] %s5706_s1 }
   0x3   :  { %5747 = sst [smem:[#allocation32_spill]] %s5707_s2 }
   0x4   :  { %5748 = sst [smem:[#allocation33_spill]] %s5719_s14 }
   0x5   :  { %5749 = sst [smem:[#allocation34_spill]] %s5720_s15 }
   0x6   :  { %5750 = sst [smem:[#allocation35_spill]] %s5721_s16 }
   0x7   :  { %5751 = sst [smem:[#allocation36_spill]] %s5722_s17 }
   0x8   :  { %23 = vsyncpa [#allocation3], 0 }
   0x9   :  { %24 = vsyncpa [#allocation6], 0 }
   0xa   :  { %25 = vsyncpa [#allocation9], 0 }
   0xb   :  { %26 = vsyncpa [#allocation12], 0 }
   0xc   :  { %27 = vsyncpa [#allocation4], 0 }
   0xd   :  { %29 = vsyncpa [#allocation4 + $0x1], 0 }
   0xe   :  { %30 = vsyncpa [#allocation15], 0 }
   0xf   :  { %32 = vsyncpa [#allocation15 + $0x1], 0  ;;  %s4783_s24 = smov 0   ;;  %s4785_s25 = smov 0  }
  0x10   :  { %s4787_s26 = smov 0   ;;  %s4789_s27 = smov 0  }
  0x11 LB: > { %5752 = sst [smem:[#allocation23_spill]] %s4653_s24  ;;  %s4804_s28 = sadd.s32 4294967295, %s4665_s27   ;;  %s4665_s27 = sphi %s4789_s27, %s5791_s27   ;;  %s4661_s26 = sphi %s4787_s26, %s5793_s26   ;;  %s4657_s25 = sphi %s4785_s25, %s5795_s25   ;;  %s4653_s24 = sphi %s4783_s24, %s5794_s24  }
  0x12   : > { %5753 = sst [smem:[#allocation24_spill]] %s4661_s26  ;;  %s5723_s29 = sadd.s32 4294967294, %s4665_s27  }
  0x13   : > { %5754 = sst [smem:[#allocation25_spill]] %s4665_s27  ;;  %s4808_s0 = sadd.s32 1, %s4665_s27  }
  0x14   : > { %5755 = sst [smem:[#allocation26_spill]] %s4808_s0  ;;  %s380_s30 = sadd.s32 1, %s4661_s26 }
  0x15   : > { %s377_s18 = ssub.s32 %s4665_s27, %s4808_s0  ;;  %p390_p0 = scmp.ne.s32.totalorder %s4661_s26, %s4657_s25 }
  0x16   : > { %p378_p1 = scmp.eq.s32.totalorder %s377_s18, 0  ;;  %p391_p2 = scmp.eq.s32.totalorder %s4804_s28, 1 }
  0x17   : > { %p396_p3 = scmp.ne.s32.totalorder %s4657_s25, %s4653_s24  ;;  %p397_p4 = scmp.eq.s32.totalorder %s5723_s29, 1 }
  0x18   : > { %s4821_s19 = scalar_select %p378_p1, %s4661_s26, %s380_s30  }
  0x19   : > { %p4823_p5 = por %p391_p2, %p390_p0  ;;  %p4827_p6 = por %p397_p4, %p396_p3 }
  0x1a   : > { %5756 = sst [smem:[#allocation27_spill]] %s4821_s19  ;;  %p3872_p7 = scmp.ge.s32.totalorder %s4665_s27, 1 }
  0x1b   : > { %s5757_s1 = scalar_select %p4823_p5, 1, 0 }
  0x1c   : > { %s5759_s20 = scalar_select %p4827_p6, 1, 0 }
  0x1d   : > { %5758 = sst [smem:[#allocation28_spill]] %s5757_s1  ;;  %p456_p8 = scmp.lt.s32.totalorder %s4665_s27, 3 }
  0x1e   : > { %5760 = sst [smem:[#allocation29_spill]] %s5759_s20  ;;  %p5732_p9 = scmp.eq.s32.totalorder %s4804_s28, 0 }
  0x1f   : > { %p4834_p10 = pnand %p3872_p7, %p456_p8  ;;  %s4667_s22 = smov [#allocation5]  }
  0x20   : > { %s479_s23 = sshll.u32 %s4667_s22, 4  ;;  %s4668_s18 = smov [#allocation8]   ;;  %s4840_s23 = int_to_ptr.vmem [resolvable:$true] %s479_s23 }
  0x21   : > { %s5761_s21 = scalar_select %p4834_p10, 1, 0 }
  0x22   : > { %p4206_p11 = pneg %p4834_p10  ;;  %s505_s29 = sshll.u32 %s4668_s18, 4  ;;  %s4848_s29 = int_to_ptr.vmem [resolvable:$true] %s505_s29 }
  0x23   : > { %s4669_s19 = smov [#allocation2]   ;;  %s4359_s22 = scalar_lea.hbm %s5710_s5, 256 }
  0x24   : > { %p4844_p12 = pnand %p5732_p9, %p4206_p11  ;;  %s4850_s26 = sshll.u32 %s4669_s19, 4  ;;  %s470_s26 = int_to_ptr.vmem [resolvable:$true] %s4850_s26 }
  0x25   : > { %p4360_p13 = scmp.ne.s32.totalorder %s5710_s5, %s4359_s22  ;;  %p4366_p3 = scmp.lt.u32.totalorder %s4359_s22, %s5710_s5 }
  0x26   : > { %p4860_p0 = pneg %p4844_p12 }
  0x28   : > { %p4362_p1 = pnand %p4860_p0, %p4360_p13 }
  0x2a   : > { %p4363_p2 = pneg %p4362_p1 }
  0x2c   : > { %p4368_p4 = pnand %p4366_p3, %p4363_p2 }
  0x2e   : > { %4371 = shalt.err (!%p4368_p4)
}
  0x2f   : > { %s4372_s24 = scalar_lea.vmem %s4840_s23, 256  ;;  %p4380_p9 = scmp.lt.s32.totalorder %s4840_s23, %s4840_s23 }
  0x30   : > { %p4373_p7 = scmp.ne.s32.totalorder %s4840_s23, %s4372_s24  ;;  %p4381_p6 = scmp.lt.s32.totalorder %s4372_s24, %s4372_s24 }
  0x32   : > { %p4375_p8 = pnand %p4373_p7, %p4860_p0  ;;  %p4382_p13 = por %p4381_p6, %p4380_p9 }
  0x34   : > { %p4376_p11 = pneg %p4375_p8 }
  0x36   : > { %p4383_p1 = pnand %p4382_p13, %p4376_p11 }
  0x38   : > { %4386 = shalt.err (!%p4383_p1)
}
  0x39   : > { %s5739_s27 = smov 64   ;;  %s4671_s0 = smov 4  }
  0x3a   : > { %4212 = dma.hbm_to_vmem [thread:$0]  (!%p4844_p12), %s5710_s5, 256, %s4840_s23, [#allocation6], %s5739_s27, %s5739_s27, %s4671_s0  }
  0x3b   : > { %s4387_s24 = scalar_lea.hbm %s5712_s7, 256 }
  0x3c   : > { %p4388_p6 = scmp.ne.s32.totalorder %s5712_s7, %s4387_s24  ;;  %p4394_p3 = scmp.lt.u32.totalorder %s4387_s24, %s5712_s7 }
  0x3e   : > { %p4390_p9 = pnand %p4388_p6, %p4860_p0 }
  0x40   : > { %p4391_p2 = pneg %p4390_p9 }
  0x42   : > { %p4396_p4 = pnand %p4394_p3, %p4391_p2 }
  0x44   : > { %4399 = shalt.err (!%p4396_p4)
}
  0x45   : > { %s4400_s23 = scalar_lea.vmem %s4848_s29, 256  ;;  %p4408_p13 = scmp.lt.s32.totalorder %s4848_s29, %s4848_s29 }
  0x46   : > { %p4401_p7 = scmp.ne.s32.totalorder %s4848_s29, %s4400_s23  ;;  %p4409_p1 = scmp.lt.s32.totalorder %s4400_s23, %s4400_s23 }
  0x48   : > { %p4403_p8 = pnand %p4401_p7, %p4860_p0  ;;  %p4410_p6 = por %p4409_p1, %p4408_p13 }
  0x4a   : > { %p4404_p11 = pneg %p4403_p8 }
  0x4c   : > { %p4411_p9 = pnand %p4410_p6, %p4404_p11 }
  0x4e   : > { %4414 = shalt.err (!%p4411_p9)
}
  0x4f   : > { %4218 = dma.hbm_to_vmem [thread:$0]  (!%p4844_p12), %s5712_s7, 256, %s4848_s29, [#allocation9], %s5739_s27, %s5739_s27, %s4671_s0  }
  0x50   : > { %s4415_s20 = scalar_lea.hbm %s5708_s3, 128 }
  0x51   : > { %p4416_p2 = scmp.ne.s32.totalorder %s5708_s3, %s4415_s20  ;;  %p4422_p7 = scmp.lt.u32.totalorder %s4415_s20, %s5708_s3 }
  0x53   : > { %p4418_p3 = pnand %p4416_p2, %p4860_p0 }
  0x55   : > { %p4419_p4 = pneg %p4418_p3 }
  0x57   : > { %p4424_p8 = pnand %p4422_p7, %p4419_p4 }
  0x59   : > { %4427 = shalt.err (!%p4424_p8)
}
  0x5a   : > { %s4428_s23 = scalar_lea.vmem %s470_s26, 128  ;;  %p4436_p6 = scmp.lt.s32.totalorder %s470_s26, %s470_s26 }
  0x5b   : > { %p4429_p11 = scmp.ne.s32.totalorder %s470_s26, %s4428_s23  ;;  %p4437_p9 = scmp.lt.s32.totalorder %s4428_s23, %s4428_s23 }
  0x5d   : > { %p4431_p13 = pnand %p4429_p11, %p4860_p0  ;;  %p4438_p5 = por %p4437_p9, %p4436_p6 }
  0x5f   : > { %p4432_p1 = pneg %p4431_p13 }
  0x61   : > { %p4439_p10 = pnand %p4438_p5, %p4432_p1 }
  0x63   : > { %4442 = shalt.err (!%p4439_p10)
}
  0x64   : > { %4209 = dma.hbm_to_vmem [thread:$0]  (!%p4844_p12), %s5708_s3, 128, %s470_s26, [#allocation3]  }
  0x65   : > { %s4672_s16 = smov [#allocation7]   ;;  %s4673_s1 = smov [#allocation10]  }
  0x66   : > { %s492_s17 = sshll.u32 %s4672_s16, 4  ;;  %s521_s20 = sshll.u32 %s4673_s1, 4  ;;  %s493_s17 = int_to_ptr.vmem [resolvable:$true] %s492_s17  ;;  %s522_s20 = int_to_ptr.vmem [resolvable:$true] %s521_s20 }
  0x67   : > { %s4443_s19 = scalar_lea.hbm %s5711_s6, 256 }
  0x68   : > { %p4444_p5 = scmp.ne.s32.totalorder %s5711_s6, %s4443_s19  ;;  %p4450_p3 = scmp.lt.u32.totalorder %s4443_s19, %s5711_s6 }
  0x6a   : > { %p4446_p10 = pnand %p4444_p5, %p4860_p0 }
  0x6c   : > { %p4447_p2 = pneg %p4446_p10 }
  0x6e   : > { %p4452_p4 = pnand %p4450_p3, %p4447_p2 }
  0x70   : > { %4455 = shalt.err (!%p4452_p4)
}
  0x71   : > { %s4456_s26 = scalar_lea.vmem %s493_s17, 256  ;;  %p4464_p13 = scmp.lt.s32.totalorder %s493_s17, %s493_s17 }
  0x72   : > { %p4457_p7 = scmp.ne.s32.totalorder %s493_s17, %s4456_s26  ;;  %p4465_p1 = scmp.lt.s32.totalorder %s4456_s26, %s4456_s26 }
  0x74   : > { %p4459_p8 = pnand %p4457_p7, %p4860_p0  ;;  %p4466_p6 = por %p4465_p1, %p4464_p13 }
  0x76   : > { %p4460_p11 = pneg %p4459_p8 }
  0x78   : > { %p4467_p9 = pnand %p4466_p6, %p4460_p11 }
  0x7a   : > { %4470 = shalt.err (!%p4467_p9)
}
  0x7b   : > { %s5764_s14 = smov 64   ;;  %s4471_s18 = scalar_lea.hbm %s5714_s9, 256 }
  0x7c   : > { %4215 = dma.hbm_to_vmem [thread:$0]  (!%p4844_p12), %s5711_s6, 256, %s493_s17, [#allocation6], %s5764_s14, %s5764_s14, %s4671_s0  }
  0x7d   : > { %p4472_p5 = scmp.ne.s32.totalorder %s5714_s9, %s4471_s18  ;;  %p4478_p3 = scmp.lt.u32.totalorder %s4471_s18, %s5714_s9 }
  0x7f   : > { %p4474_p10 = pnand %p4472_p5, %p4860_p0 }
  0x81   : > { %p4475_p2 = pneg %p4474_p10 }
  0x83   : > { %p4480_p4 = pnand %p4478_p3, %p4475_p2 }
  0x85   : > { %4483 = shalt.err (!%p4480_p4)
}
  0x86   : > { %s4484_s26 = scalar_lea.vmem %s522_s20, 256  ;;  %p4492_p13 = scmp.lt.s32.totalorder %s522_s20, %s522_s20 }
  0x87   : > { %p4485_p7 = scmp.ne.s32.totalorder %s522_s20, %s4484_s26  ;;  %p4493_p1 = scmp.lt.s32.totalorder %s4484_s26, %s4484_s26 }
  0x89   : > { %p4487_p8 = pnand %p4485_p7, %p4860_p0  ;;  %p4494_p6 = por %p4493_p1, %p4492_p13 }
  0x8b   : > { %p4488_p11 = pneg %p4487_p8 }
  0x8d   : > { %p4495_p9 = pnand %p4494_p6, %p4488_p11 }
  0x8f   : > { %4498 = shalt.err (!%p4495_p9)
}
  0x90   : > { %4221 = dma.hbm_to_vmem [thread:$0]  (!%p4844_p12), %s5714_s9, 256, %s522_s20, [#allocation9], %s5764_s14, %s5764_s14, %s4671_s0  }
  0x91   : > { %s4674_s16 = smov [#allocation11]   ;;  %s4499_s19 = scalar_lea.hbm %s5715_s10, 256 }
  0x92   : > { %s534_s1 = sshll.u32 %s4674_s16, 4  ;;  %p4500_p5 = scmp.ne.s32.totalorder %s5715_s10, %s4499_s19  ;;  %s535_s1 = int_to_ptr.vmem [resolvable:$true] %s534_s1 }
  0x93   : > { %p4506_p3 = scmp.lt.u32.totalorder %s4499_s19, %s5715_s10 }
  0x94   : > { %p4502_p10 = pnand %p4500_p5, %p4860_p0 }
  0x96   : > { %p4503_p2 = pneg %p4502_p10 }
  0x98   : > { %p4508_p4 = pnand %p4506_p3, %p4503_p2 }
  0x9a   : > { %4511 = shalt.err (!%p4508_p4)
}
  0x9b   : > { %s4512_s20 = scalar_lea.vmem %s535_s1, 256  ;;  %p4520_p13 = scmp.lt.s32.totalorder %s535_s1, %s535_s1 }
  0x9c   : > { %p4513_p7 = scmp.ne.s32.totalorder %s535_s1, %s4512_s20  ;;  %p4521_p1 = scmp.lt.s32.totalorder %s4512_s20, %s4512_s20 }
  0x9e   : > { %p4515_p8 = pnand %p4513_p7, %p4860_p0  ;;  %p4522_p6 = por %p4521_p1, %p4520_p13 }
  0xa0   : > { %p4516_p11 = pneg %p4515_p8 }
  0xa2   : > { %p4523_p9 = pnand %p4522_p6, %p4516_p11 }
  0xa4   : > { %4526 = shalt.err (!%p4523_p9)
}
  0xa5   : > { %4224 = dma.hbm_to_vmem [thread:$0]  (!%p4844_p12), %s5715_s10, 256, %s535_s1, [#allocation12], %s5764_s14, %s5764_s14, %s4671_s0  }
  0xa6   : > { %p5765_p5 = scmp.ne.s32.totalorder %s5761_s21, 0 }
  0xa7   : > { %p5766_p0 = scmp.eq.s32.totalorder (!%p5765_p5), %s4804_s28, 0 }
  0xa8   : > { %591 = sbr.rel (%p5765_p5) target bundleno = 4725 (0x1275), region = 80 }
  0xaf   : > { %4628 = dma.done.wait (%p5766_p0), [#allocation3], 128   ;;  %p5767_p10 = pmov %p5766_p0 }
  0xb0   : > { %p5768_p2 = pmov %p5766_p0 }
  0xb1   : > { %4630 = vsyncadd (%p5767_p10), [#allocation3], 4294967168 }
  0xb2   : > { %4632 = dma.done.wait (%p5768_p2), [#allocation6], 512   ;;  %p5769_p3 = pmov %p5766_p0 }
  0xb3   : > { %p5770_p4 = pmov %p5766_p0 }
  0xb4   : > { %4634 = vsyncadd (%p5769_p3), [#allocation6], 4294966784 }
  0xb5   : > { %4636 = dma.done.wait (%p5770_p4), [#allocation9], 512   ;;  %p5771_p12 = pmov %p5766_p0 }
  0xb6   : > { %p5772_p7 = pmov %p5766_p0 }
  0xb7   : > { %4638 = vsyncadd (%p5771_p12), [#allocation9], 4294966784 }
  0xb8   : > { %4640 = dma.done.wait (%p5772_p7), [#allocation12], 256   ;;  %p5773_p8 = pmov %p5766_p0 }
  0xb9   : > { %p685_p11 = scmp.lt.s32.totalorder %s4804_s28, 1  ;;  %v4675_v0 = vmov 0.0   ;;  %vm4676_vm0 = vmmov 0   ;;  %s5774_s14 = sld [smem:[#allocation30_spill]]  ;;  %v4304_v1 = vld [vmem:[#allocation5] sm:$0xff]   ;;  %v4305_v2 = vld [vmem:[#allocation5 + $0x8] sm:$0xff]   ;;  %v719_v5 = vlaneseq }
  0xba   : > { %4642 = vsyncadd (%p5773_p8), [#allocation12], 4294967040  ;;  %4020 = vmatprep.subr.bf16.mxu1 %v4675_v0  ;;  %4024 = vmatprep.mubr.msk.bf16.mxu1 %vm4676_vm0, %v4675_v0  ;;  %vm735_vm1 = vcmask 261120   ;;  %v5042_v8 = vld [vmem:[%s5717_s12] sm:$0x3]  ;;  %s4677_s18 = smov 104  }
  0xbb   : > { %s5015_s15 = scalar_select %p685_p11, %s4804_s28, 1  ;;  %4034 = vmatprep.subr.bf16.mxu0 %v4675_v0  ;;  %4036 = vmatprep.mubr.msk.bf16.mxu0 %vm4676_vm0, %v4675_v0  ;;  %v5036_v6 = vshrl.u32 %v719_v5, 7  ;;  %v4681_v18 = vmov 1983009808   ;;  %v4682_v21 = vmov 1934713408  }
  0xbc   : > { %4021 = vmatpush3.bf16.msra.mxu1 %v4304_v1  ;;  %s4678_s19 = smov 120   ;;  %s4679_s24 = smov 96   ;;  %v796_v19 = vunpack.c.l.s4 %v4681_v18  ;;  %v828_v22 = vunpack.c.l.s4 %v4682_v21  ;;  %vm1233_vm2 = vcmask 64512   ;;  %vm1473_vm3 = vcmask 1043456  }
  0xbd   : > { %s5021_s21 = sshll.u32 %s5015_s15, 3  ;;  %4022 = vmatprep.subr.bf16.mxu1 %v4675_v0  ;;  %v721_v7 = vsub.s32 0, %v5036_v6  ;;  %s4680_s23 = smov 112   ;;  %vm1804_vm4 = vcmask 130048   ;;  %vm1806_vm5 = vcmask 195584   ;;  %vm3523_vm6 = vcmask 523264  }
  0xbe   : > { %v797_v20 = vunpack.c.0.s8 %v796_v19  ;;  %v829_v28 = vunpack.c.0.s8 %v828_v22  ;;  %s4683_s29 = smov 64   ;;  %s5154_s26 = sand.u32 1, %s4657_s25  }
  0xbf   : > { %s688_s16 = scalar_lea.vmem %s5774_s14, %s5021_s21  ;;  %v722_v9 = vrot.slane %v5042_v8, %v721_v7  ;;  %s3888_s20 = sshll.u32 %s5154_s26, 5 }
  0xc0   : > { %v5027_v3 = vld [vmem:[%s688_s16] sm:$0xff]  ;;  %4023 = vmatpush3.bf16.msra.mxu1 %v4305_v2  ;;  %v5074_v25 = vsub.s32 %v797_v20, %v5036_v6  ;;  %v5085_v35 = vsub.s32 %v829_v28, %v5036_v6  ;;  %s5167_s17 = scalar_lea.vmem [#allocation14], %s3888_s20  ;;  %s5744_s16 = smov 16  }
  0xc1   : > { %v714_v4 = vpack.c.bf16 %v5027_v3, %v5027_v3  ;;  %4028 = vmatprep.subr.bf16.mxu1 %v4675_v0  ;;  %s5742_s1 = smov 8   ;;  %s5741_s22 = smov 24  }
  0xc2   : > { %s3964_s30 = sshll.u32 %s5015_s15, 4  ;;  %s5775_s2 = sld [smem:[#allocation32_spill]] }
  0xc3   : > { %4025 = vmatmul.mubr.msk.bf16.vlgmr.msra.gmra.mrb[0].mxu1 %vm735_vm1, %v714_v4  ;;  %s3637_s15 = sshll.u32 %s5167_s17, 4  ;;  %s5583_s15 = int_to_ptr.vmem [resolvable:$true] %s3637_s15 }
  0xc4   : > { %4030 = vmatprep.mubr.msk.bf16.mxu1 %vm4676_vm0, %v4675_v0 }
 0x196   : > { %v773_v10 = vpop.f32.mrb[0].mxu1 }
 0x197   : > { %v5047_v11 = vadd.f32 %v773_v10, %v722_v9  ;;  %v4026_v12 = vpop.f32.mrb[1].mxu1 }
 0x198   : > { %v776_v13 = vpop.f32.mrb[2].mxu1 }
 0x199   : > { %790 = vrot.lane.b32.xlu1 %v5047_v11, %s4677_s18  ;;  %784 = vrot.lane.b32.xlu0 %v5047_v11, %s4678_s19  ;;  %v4027_v14 = vpop.f32.mrb[3].mxu1 }
 0x19d   : > { %929 = vrot.lane.b32.xlu1 %v5047_v11, %s4679_s24  ;;  %787 = vrot.lane.b32.xlu0 %v5047_v11, %s4680_s23 }
 0x20b   : > { %v5057_v15 = vpop.permute.xlu0 %784  ;;  %v5061_v16 = vpop.permute.xlu1 %790 }
 0x20c   : > { %931 = vrot.lane.b32.xlu0 %v5057_v15, %s4679_s24  ;;  %v809_v26 = vcombine.low %v5057_v15, %v5061_v16  ;;  %v810_v27 = vcombine.high %v5057_v15, %v5061_v16 }
 0x20e   : > { %v817_v31 = vrot.slane %v809_v26, %v5074_v25  ;;  %v824_v32 = vrot.slane %v810_v27, %v5074_v25 }
 0x20f   : > { %v5063_v17 = vpop.permute.xlu0 %787  ;;  %v930_v33 = vpop.permute.xlu1 %929 }
 0x210   : > { %935 = vrot.lane.b32.xlu0 %v5061_v16, %s4679_s24  ;;  %933 = vrot.lane.b32.xlu1 %v5063_v17, %s4679_s24  ;;  %v793_v23 = vcombine.low %v5047_v11, %v5063_v17  ;;  %v794_v24 = vcombine.high %v5047_v11, %v5063_v17 }
 0x212   : > { %v801_v29 = vrot.slane %v793_v23, %v5074_v25  ;;  %v808_v30 = vrot.slane %v794_v24, %v5074_v25 }
 0x214   : > { %v825_v36 = vcombine.low %v801_v29, %v817_v31  ;;  %v826_v37 = vcombine.high %v801_v29, %v817_v31  ;;  %v841_v38 = vcombine.low %v808_v30, %v824_v32  ;;  %v842_v39 = vcombine.high %v808_v30, %v824_v32 }
 0x216   : > { %v833_v46 = vrot.slane %v825_v36, %v5085_v35  ;;  %v840_v47 = vrot.slane %v826_v37, %v5085_v35  ;;  %v849_v48 = vrot.slane %v841_v38, %v5085_v35  ;;  %v856_v49 = vrot.slane %v842_v39, %v5085_v35 }
 0x218   : > { %v861_v58 = vcombine.low %v833_v46, %v840_v47  ;;  %v3898_v59 = vcombine.high %v833_v46, %v840_v47  ;;  %v877_v60 = vcombine.low %v849_v48, %v856_v49  ;;  %v3899_v61 = vcombine.high %v849_v48, %v856_v49 }
 0x21a   : > { %v868_v12 = vrot.slane %v861_v58, %v5074_v25  ;;  %v876_v13 = vrot.slane %v3898_v59, %v5074_v25  ;;  %v884_v14 = vrot.slane %v877_v60, %v5074_v25  ;;  %v892_v18 = vrot.slane %v3899_v61, %v5074_v25  ;;  %v707_v61 = vld [vmem:[#allocation2] sm:$0xff] }
 0x21c   : > { %v893_v30 = vcombine.low %v868_v12, %v876_v13  ;;  %v909_v31 = vcombine.low %v884_v14, %v892_v18  ;;  %v910_v48 = vcombine.high %v884_v14, %v892_v18 }
 0x21e   : > { %v901_v39 = vrot.slane %v893_v30, %v5085_v35 }
 0x27e   : > { %v932_v34 = vpop.permute.xlu0 %931 }
 0x282   : > { %v934_v40 = vpop.permute.xlu1 %933  ;;  %v936_v41 = vpop.permute.xlu0 %935 }
 0x283   : > { %v941_v42 = vcombine.low %v930_v33, %v934_v40  ;;  %v942_v43 = vcombine.high %v930_v33, %v934_v40  ;;  %v957_v44 = vcombine.low %v932_v34, %v936_v41  ;;  %v958_v45 = vcombine.high %v932_v34, %v936_v41 }
 0x284   : > { %v917_v40 = vrot.slane %v909_v31, %v5085_v35 }
 0x285   : > { %v949_v50 = vrot.slane %v941_v42, %v5074_v25  ;;  %v956_v51 = vrot.slane %v942_v43, %v5074_v25  ;;  %v965_v52 = vrot.slane %v957_v44, %v5074_v25  ;;  %v972_v53 = vrot.slane %v958_v45, %v5074_v25 }
 0x286   : > { %v894_v45 = vcombine.high %v868_v12, %v876_v13  ;;  %v925_v46 = vcombine.low %v901_v39, %v917_v40  ;;  %v926_v47 = vcombine.high %v901_v39, %v917_v40 }
 0x287   : > { %v973_v54 = vcombine.low %v949_v50, %v965_v52  ;;  %v974_v55 = vcombine.high %v949_v50, %v965_v52  ;;  %v989_v56 = vcombine.low %v956_v51, %v972_v53  ;;  %v990_v57 = vcombine.high %v956_v51, %v972_v53 }
 0x288   : > { %v1225_v51 = vpack.c.bf16 %v925_v46, %v925_v46  ;;  %v1226_v52 = vpack.c.bf16 %v926_v47, %v926_v47  ;;  %v908_v53 = vrot.slane %v894_v45, %v5085_v35 }
 0x289   : > { %v981_v62 = vrot.slane %v973_v54, %v5085_v35  ;;  %v988_v63 = vrot.slane %v974_v55, %v5085_v35  ;;  %v997_v1 = vrot.slane %v989_v56, %v5085_v35  ;;  %v1004_v2 = vrot.slane %v990_v57, %v5085_v35 }
 0x28a   : > { %v924_v54 = vrot.slane %v910_v48, %v5085_v35 }
 0x28b   : > { %v1009_v4 = vcombine.low %v981_v62, %v988_v63  ;;  %v3900_v5 = vcombine.high %v981_v62, %v988_v63  ;;  %v1025_v9 = vcombine.low %v997_v1, %v1004_v2  ;;  %v3901_v10 = vcombine.high %v997_v1, %v1004_v2 }
 0x28c   : > { %v927_v57 = vcombine.low %v908_v53, %v924_v54  ;;  %v928_v58 = vcombine.high %v908_v53, %v924_v54  ;;  %v708_v62 = vmul.f32 -1e+30, %v707_v61 }
 0x28d   : > { %v1016_v19 = vrot.slane %v1009_v4, %v5074_v25  ;;  %v1024_v20 = vrot.slane %v3900_v5, %v5074_v25  ;;  %v1032_v21 = vrot.slane %v1025_v9, %v5074_v25  ;;  %v1040_v22 = vrot.slane %v3901_v10, %v5074_v25 }
 0x28e   : > { %v1227_v59 = vpack.c.bf16 %v927_v57, %v927_v57  ;;  %v1228_v60 = vpack.c.bf16 %v928_v58, %v928_v58 }
 0x28f   : > { %v1041_v23 = vcombine.low %v1016_v19, %v1024_v20  ;;  %v1057_v24 = vcombine.low %v1032_v21, %v1040_v22  ;;  %v1042_v26 = vcombine.high %v1016_v19, %v1024_v20  ;;  %v1058_v27 = vcombine.high %v1032_v21, %v1040_v22 }
 0x291   : > { %v1049_v28 = vrot.slane %v1041_v23, %v5085_v35  ;;  %v1065_v29 = vrot.slane %v1057_v24, %v5085_v35  ;;  %v1056_v34 = vrot.slane %v1042_v26, %v5085_v35  ;;  %v1072_v36 = vrot.slane %v1058_v27, %v5085_v35 }
 0x293   : > { %v1073_v32 = vcombine.low %v1049_v28, %v1065_v29  ;;  %v1074_v33 = vcombine.high %v1049_v28, %v1065_v29  ;;  %v1075_v43 = vcombine.low %v1056_v34, %v1072_v36  ;;  %v1076_v44 = vcombine.high %v1056_v34, %v1072_v36 }
 0x295   : > { %v1229_v37 = vpack.c.bf16 %v1073_v32, %v1073_v32  ;;  %v1230_v38 = vpack.c.bf16 %v1074_v33, %v1074_v33  ;;  %v1231_v49 = vpack.c.bf16 %v1075_v43, %v1075_v43  ;;  %v1232_v50 = vpack.c.bf16 %v1076_v44, %v1076_v44 }
 0x297   : > { %v1238_v41 = vsel %vm1233_vm2, %v1229_v37, 0  ;;  %v1284_v42 = vsel %vm1233_vm2, %v1230_v38, 0  ;;  %v1330_v55 = vsel %vm1233_vm2, %v1231_v49, 0  ;;  %v1376_v56 = vsel %vm1233_vm2, %v1232_v50, 0 }
 0x298   : > { %4029 = vmatpush3.bf16.xpose.msra.mxu1 %v1238_v41  ;;  %4035 = vmatpush3.bf16.xpose.msra.mxu0 %v1284_v42 }
 0x299   : > { %4040 = vmatprep.subr.bf16.mxu1 %v4675_v0  ;;  %4046 = vmatprep.subr.bf16.mxu0 %v4675_v0 }
 0x29f   : > { %4031 = vmatmul.mubr.msk.bf16.vlgmr.msra.gmra.mrb[4].mxu1 %vm1233_vm2, %v1225_v51  ;;  %4037 = vmatmul.mubr.msk.bf16.vlgmr.msra.gmra.mrb[0].mxu0 %vm1233_vm2, %v1226_v52 }
 0x2a0   : > { %4041 = vmatpush3.bf16.xpose.msra.mxu1 %v1330_v55  ;;  %4047 = vmatpush3.bf16.xpose.msra.mxu0 %v1376_v56 }
 0x2a1   : > { %4042 = vmatprep.mubr.msk.bf16.mxu1 %vm4676_vm0, %v4675_v0  ;;  %4048 = vmatprep.mubr.msk.bf16.mxu0 %vm4676_vm0, %v4675_v0 }
 0x2a2   : > { %4052 = vmatprep.subr.bf16.mxu1 %v4675_v0  ;;  %4058 = vmatprep.subr.bf16.mxu0 %v4675_v0 }
 0x2a7   : > { %4043 = vmatmul.mubr.msk.bf16.vlgmr.msra.gmra.mrb[8].mxu1 %vm1233_vm2, %v1227_v59  ;;  %4049 = vmatmul.mubr.msk.bf16.vlgmr.msra.gmra.mrb[4].mxu0 %vm1233_vm2, %v1228_v60 }
 0x2a8   : > { %4054 = vmatprep.mubr.msk.bf16.mxu1 %vm4676_vm0, %v4675_v0  ;;  %4060 = vmatprep.mubr.msk.bf16.mxu0 %vm4676_vm0, %v4675_v0 }
 0x372   : > { %v1274_v63 = vpop.f32.mrb[4].mxu1  ;;  %v1320_v1 = vpop.f32.mrb[0].mxu0 }
 0x373   : > { %v1275_v2 = vadd.f32 %v1274_v63, %v708_v62  ;;  %v1321_v4 = vadd.f32 %v1320_v1, %v708_v62  ;;  %v4032_v5 = vpop.f32.mrb[5].mxu1  ;;  %v4038_v9 = vpop.f32.mrb[1].mxu0 }
 0x374   : > { %v1277_v10 = vpop.f32.mrb[6].mxu1  ;;  %v1323_v12 = vpop.f32.mrb[2].mxu0 }
 0x375   : > { %v4033_v13 = vpop.f32.mrb[7].mxu1  ;;  %v4039_v14 = vpop.f32.mrb[3].mxu0  ;;  %v1421_v18 = vsel %vm1233_vm2, %v1321_v4, -inf  ;;  %v1418_v19 = vsel %vm1233_vm2, %v1275_v2, -inf }
 0x376   : > { %1422 = vmax.xlane.f32.xlu0 %v1421_v18  ;;  %1419 = vmax.xlane.f32.xlu1 %v1418_v19 }
 0x37a   : > { %v1366_v20 = vpop.f32.mrb[8].mxu1  ;;  %v1412_v21 = vpop.f32.mrb[4].mxu0 }
 0x37b   : > { %v1367_v22 = vadd.f32 %v1366_v20, %v708_v62  ;;  %v1413_v23 = vadd.f32 %v1412_v21, %v708_v62  ;;  %v4044_v24 = vpop.f32.mrb[9].mxu1  ;;  %v4050_v26 = vpop.f32.mrb[5].mxu0 }
 0x37c   : > { %v1369_v27 = vpop.f32.mrb[10].mxu1  ;;  %v1415_v28 = vpop.f32.mrb[6].mxu0 }
 0x37d   : > { %v4045_v29 = vpop.f32.mrb[11].mxu1  ;;  %v4051_v30 = vpop.f32.mrb[7].mxu0  ;;  %v1427_v31 = vsel %vm1233_vm2, %v1413_v23, -inf  ;;  %v1424_v32 = vsel %vm1233_vm2, %v1367_v22, -inf }
 0x37e   : > { %1428 = vmax.xlane.f32.xlu1 %v1427_v31  ;;  %1425 = vmax.xlane.f32.xlu0 %v1424_v32 }
 0x38f   : > { %1079 = vrot.lane.b32.xlu1 %v5057_v15, %s4683_s29 }
 0x394   : > { %1077 = vrot.lane.b32.xlu0 %v5047_v11, %s4683_s29 }
 0x403   : > { %v1423_v33 = vpop.xlane.xlu0 %1422  ;;  %v1420_v34 = vpop.xlane.xlu1 %1419 }
 0x404   : > { %v1431_v36 = vsub.f32 %v1321_v4, %v1423_v33  ;;  %v1430_v37 = vsub.f32 %v1275_v2, %v1420_v34 }
 0x406   : > { %v1436_v38 = vmul.f32 1.442695, %v1431_v36  ;;  %v1434_v39 = vmul.f32 1.442695, %v1430_v37 }
 0x408   : > { %4320 = vpow2.f32 %v1436_v38 }
 0x409   : > { %4322 = vpow2.f32 %v1434_v39 }
 0x40b   : > { %v1426_v11 = vpop.xlane.xlu0 %1425  ;;  %v1429_v15 = vpop.xlane.xlu1 %1428 }
 0x40c   : > { %v1432_v44 = vsub.f32 %v1367_v22, %v1426_v11  ;;  %v1433_v45 = vsub.f32 %v1413_v23, %v1429_v15 }
 0x40e   : > { %v1438_v46 = vmul.f32 1.442695, %v1432_v44  ;;  %v1440_v47 = vmul.f32 1.442695, %v1433_v45 }
 0x40f   : > { %v1078_v51 = vpop.permute.xlu0 %1077 }
 0x410   : > { %4324 = vpow2.f32 %v1438_v46 }
 0x411   : > { %4326 = vpow2.f32 %v1440_v47 }
 0x412   : > { %v4321_v40 = vpop.eup %4320 }
 0x413   : > { %v4323_v41 = vpop.eup %4322  ;;  %v1445_v42 = vsel %vm1233_vm2, %v4321_v40, 0.0 }
 0x414   : > { %1446 = vadd.xlane.f32.xlu1 %v1445_v42  ;;  %v1442_v43 = vsel %vm1233_vm2, %v4323_v41, 0.0 }
 0x415   : > { %1443 = vadd.xlane.f32.xlu0 %v1442_v43 }
 0x41a   : > { %v5145_v48 = vpop.eup %4324 }
 0x41b   : > { %v5147_v49 = vpop.eup %4326  ;;  %v1448_v50 = vsel %vm1233_vm2, %v5145_v48, 0.0 }
 0x425   : > { %1081 = vrot.lane.b32.xlu1 %v5063_v17, %s4683_s29  ;;  %v1451_v17 = vsel %vm1233_vm2, %v5147_v49, 0.0 }
 0x42b   : > { %1083 = vrot.lane.b32.xlu0 %v5061_v16, %s4683_s29  ;;  %v1080_v16 = vpop.permute.xlu1 %1079  ;;  %s697_s29 = scalar_lea.vmem %s5775_s2, %s5021_s21 }
 0x449   : > { %1449 = vadd.xlane.f32.xlu1 %v1448_v50 }
 0x44a   : > { %1452 = vadd.xlane.f32.xlu0 %v1451_v17 }
 0x4a1   : > { %v1447_v52 = vpop.xlane.xlu1 %1446 }
 0x4a2   : > { %4328 = vrcp.f32 %v1447_v52  ;;  %v1444_v53 = vpop.xlane.xlu0 %1443 }
 0x4a3   : > { %4330 = vrcp.f32 %v1444_v53 }
 0x4a5   : > { %v1082_v54 = vpop.permute.xlu1 %1081 }
 0x4a6   : > { %v1089_v55 = vcombine.low %v1078_v51, %v1082_v54  ;;  %v1090_v56 = vcombine.high %v1078_v51, %v1082_v54  ;;  %v1084_v57 = vpop.permute.xlu0 %1083 }
 0x4a7   : > { %v1105_v58 = vcombine.low %v1080_v16, %v1084_v57  ;;  %v1106_v59 = vcombine.high %v1080_v16, %v1084_v57 }
 0x4a8   : > { %v1097_v60 = vrot.slane %v1089_v55, %v5074_v25  ;;  %v1104_v61 = vrot.slane %v1090_v56, %v5074_v25 }
 0x4a9   : > { %v1113_v62 = vrot.slane %v1105_v58, %v5074_v25  ;;  %v1120_v63 = vrot.slane %v1106_v59, %v5074_v25 }
 0x4ab   : > { %v1121_v1 = vcombine.low %v1097_v60, %v1113_v62  ;;  %v1122_v2 = vcombine.high %v1097_v60, %v1113_v62  ;;  %v1137_v4 = vcombine.low %v1104_v61, %v1120_v63  ;;  %v1138_v5 = vcombine.high %v1104_v61, %v1120_v63 }
 0x4ac   : > { %v4329_v9 = vpop.eup %4328 }
 0x4ad   : > { %v4331_v10 = vpop.eup %4330  ;;  %v1459_v12 = vmul.f32 %v4329_v9, %v4321_v40  ;;  %v1129_v13 = vrot.slane %v1121_v1, %v5085_v35  ;;  %v1136_v14 = vrot.slane %v1122_v2, %v5085_v35  ;;  %v1145_v18 = vrot.slane %v1137_v4, %v5085_v35 }
 0x4ae   : > { %v1458_v19 = vmul.f32 %v4331_v10, %v4323_v41  ;;  %v1152_v20 = vrot.slane %v1138_v5, %v5085_v35 }
 0x4af   : > { %3594 = vst.msk [vmem:[%s5167_s17 + $0x8] sm:$0xff] %vm1233_vm2, %v1459_v12  ;;  %v1157_v21 = vcombine.low %v1129_v13, %v1136_v14  ;;  %v3902_v22 = vcombine.high %v1129_v13, %v1136_v14  ;;  %v1463_v50 = vpack.c.bf16 %v1459_v12, %v1459_v12 }
 0x4b0   : > { %3593 = vst.msk [vmem:[%s5167_s17] sm:$0xff] %vm1233_vm2, %v1458_v19  ;;  %v1173_v23 = vcombine.low %v1145_v18, %v1152_v20  ;;  %v3903_v24 = vcombine.high %v1145_v18, %v1152_v20  ;;  %v1462_v47 = vpack.c.bf16 %v1458_v19, %v1458_v19 }
 0x4b1   : > { %v1164_v26 = vrot.slane %v1157_v21, %v5074_v25  ;;  %v1172_v27 = vrot.slane %v3902_v22, %v5074_v25 }
 0x4b2   : > { %v1180_v28 = vrot.slane %v1173_v23, %v5074_v25  ;;  %v1188_v29 = vrot.slane %v3903_v24, %v5074_v25 }
 0x4b3   : > { %v1189_v30 = vcombine.low %v1164_v26, %v1172_v27  ;;  %v1190_v31 = vcombine.high %v1164_v26, %v1172_v27 }
 0x4b4   : > { %v1205_v32 = vcombine.low %v1180_v28, %v1188_v29  ;;  %v1206_v33 = vcombine.high %v1180_v28, %v1188_v29 }
 0x4b5   : > { %v1197_v34 = vrot.slane %v1189_v30, %v5085_v35  ;;  %v1204_v36 = vrot.slane %v1190_v31, %v5085_v35  ;;  %v4306_v31 = vld [vmem:[%s5713_s8] sm:$0xff]  }
 0x4b6   : > { %v1213_v37 = vrot.slane %v1205_v32, %v5085_v35  ;;  %v1220_v38 = vrot.slane %v1206_v33, %v5085_v35 }
 0x4b8   : > { %v1221_v39 = vcombine.low %v1197_v34, %v1213_v37  ;;  %v1222_v40 = vcombine.high %v1197_v34, %v1213_v37  ;;  %v1223_v41 = vcombine.low %v1204_v36, %v1220_v38  ;;  %v1224_v42 = vcombine.high %v1204_v36, %v1220_v38 }
 0x4ba   : > { %v1466_v43 = vpack.c.bf16 %v1221_v39, %v1221_v39  ;;  %v1467_v11 = vpack.c.bf16 %v1222_v40, %v1222_v40  ;;  %v1468_v45 = vpack.c.bf16 %v1223_v41, %v1223_v41  ;;  %v1469_v46 = vpack.c.bf16 %v1224_v42, %v1224_v42  ;;  %v4307_v41 = vld [vmem:[%s5713_s8 + $0x8] sm:$0xff]  }
 0x4bc   : > { %v1475_v15 = vsel %vm1473_vm3, %v1466_v43, 0  ;;  %v1521_v44 = vsel %vm1473_vm3, %v1467_v11, 0  ;;  %v1567_v17 = vsel %vm1473_vm3, %v1468_v45, 0  ;;  %v1613_v16 = vsel %vm1473_vm3, %v1469_v46, 0 }
 0x4bd   : > { %4053 = vmatpush3.bf16.msra.mxu1 %v1475_v15  ;;  %4059 = vmatpush3.bf16.msra.mxu0 %v1521_v44 }
 0x4be   : > { %4064 = vmatprep.subr.bf16.mxu1 %v4675_v0  ;;  %4070 = vmatprep.subr.bf16.mxu0 %v4675_v0 }
 0x4c0   : > { %4055 = vmatmul.mubr.msk.bf16.vlgmr.msra.gmra.mrb[12].mxu1 %vm1233_vm2, %v1462_v47  ;;  %4061 = vmatmul.mubr.msk.bf16.vlgmr.msra.gmra.mrb[8].mxu0 %vm1233_vm2, %v1463_v50 }
 0x4c1   : > { %4065 = vmatpush3.bf16.msra.mxu1 %v1567_v17  ;;  %4071 = vmatpush3.bf16.msra.mxu0 %v1613_v16 }
 0x4c2   : > { %4066 = vmatprep.mubr.msk.bf16.mxu1 %vm4676_vm0, %v4675_v0  ;;  %4072 = vmatprep.mubr.msk.bf16.mxu0 %vm4676_vm0, %v4675_v0 }
 0x4c3   : > { %4076 = vmatprep.subr.bf16.mxu1 %v4675_v0  ;;  %4084 = vmatprep.subr.bf16.mxu0 %v4675_v0 }
 0x4d6   : > { %v1450_v51 = vpop.xlane.xlu1 %1449 }
 0x4d7   : > { %4332 = vrcp.f32 %v1450_v51  ;;  %v1453_v52 = vpop.xlane.xlu0 %1452 }
 0x4d8   : > { %4334 = vrcp.f32 %v1453_v52 }
 0x4e1   : > { %v4333_v53 = vpop.eup %4332 }
 0x4e2   : > { %v4335_v54 = vpop.eup %4334  ;;  %v1460_v55 = vmul.f32 %v4333_v53, %v5145_v48 }
 0x4e3   : > { %v1461_v56 = vmul.f32 %v4335_v54, %v5147_v49 }
 0x4e4   : > { %3595 = vst.msk [vmem:[%s5167_s17 + $0x10] sm:$0xff] %vm1233_vm2, %v1460_v55  ;;  %v1464_v57 = vpack.c.bf16 %v1460_v55, %v1460_v55 }
 0x4e5   : > { %3596 = vst.msk [vmem:[%s5167_s17 + $0x18] sm:$0xff] %vm1233_vm2, %v1461_v56  ;;  %v1465_v58 = vpack.c.bf16 %v1461_v56, %v1461_v56 }
 0x4e6   : > { %4067 = vmatmul.mubr.msk.bf16.vlgmr.msra.gmra.mrb[16].mxu1 %vm1233_vm2, %v1464_v57 }
 0x4e7   : > { %4073 = vmatmul.mubr.msk.bf16.vlgmr.msra.gmra.mrb[12].mxu0 %vm1233_vm2, %v1465_v58  ;;  %4080 = vmatprep.mubr.msk.bf16.mxu1 %vm4676_vm0, %v4675_v0 }
 0x4e8   : > { %4088 = vmatprep.mubr.msk.bf16.mxu0 %vm4676_vm0, %v4675_v0  ;;  %4077 = vmatpush3.bf16.msra.mxu1 %v4306_v31 }
 0x4e9   : > { %4078 = vmatprep.subr.bf16.mxu1 %v4675_v0 }
 0x4ec   : > { %4079 = vmatpush3.bf16.msra.mxu1 %v4307_v41 }
 0x4ed   : > { %4092 = vmatprep.subr.bf16.mxu1 %v4675_v0 }
 0x593   : > { %v1511_v59 = vpop.f32.mrb[12].mxu1  ;;  %v1557_v48 = vpop.f32.mrb[8].mxu0 }
 0x594   : > { %v4056_v60 = vpop.f32.mrb[13].mxu1  ;;  %v4062_v49 = vpop.f32.mrb[9].mxu0 }
 0x595   : > { %v1514_v61 = vpop.f32.mrb[14].mxu1  ;;  %v1560_v62 = vpop.f32.mrb[10].mxu0 }
 0x596   : > { %v4057_v63 = vpop.f32.mrb[15].mxu1  ;;  %v4063_v1 = vpop.f32.mrb[11].mxu0  ;;  %v5243_v61 = vld [vmem:[%s5718_s13] sm:$0xff] }
 0x597   : > { %v1812_v62 = vrot.slane %v5243_v61, %v721_v7  ;;  %v4687_v7 = vmov 0  }
 0x598   : > { %4303 = vset.pattern.permute.xlu0 %v4687_v7 }
 0x5b9   : > { %v1603_v2 = vpop.f32.mrb[16].mxu1 }
 0x5ba   : > { %v1655_v4 = vcombine.low %v1511_v59, %v1603_v2  ;;  %v1656_v5 = vcombine.high %v1511_v59, %v1603_v2  ;;  %v1649_v9 = vpop.f32.mrb[12].mxu0  ;;  %v4068_v10 = vpop.f32.mrb[17].mxu1 }
 0x5bb   : > { %v1671_v12 = vcombine.low %v1557_v48, %v1649_v9  ;;  %v1672_v13 = vcombine.high %v1557_v48, %v1649_v9  ;;  %v4074_v14 = vpop.f32.mrb[13].mxu0  ;;  %v1606_v18 = vpop.f32.mrb[18].mxu1 }
 0x5bc   : > { %v1663_v19 = vrot.slane %v1655_v4, %v5074_v25  ;;  %v1670_v20 = vrot.slane %v1656_v5, %v5074_v25  ;;  %v1652_v21 = vpop.f32.mrb[14].mxu0  ;;  %v4069_v22 = vpop.f32.mrb[19].mxu1  ;;  %v4309_v14 = vld [vmem:[#allocation8 + $0x8] sm:$0xff]  }
 0x5bd   : > { %v1679_v23 = vrot.slane %v1671_v12, %v5074_v25  ;;  %v1686_v24 = vrot.slane %v1672_v13, %v5074_v25  ;;  %v4075_v26 = vpop.f32.mrb[15].mxu0  ;;  %v4308_v12 = vld [vmem:[#allocation8] sm:$0xff]   ;;  %v706_v13 = vld [vmem:[%s697_s29] sm:$0xff]  ;;  %s5782_s29 = sld [smem:[#allocation35_spill]] }
 0x5be   : > { %v1885_v26 = vsub.s32 1, %v5036_v6 }
 0x5bf   : > { %v1687_v27 = vcombine.low %v1663_v19, %v1679_v23  ;;  %v1688_v28 = vcombine.high %v1663_v19, %v1679_v23  ;;  %v1703_v29 = vcombine.low %v1670_v20, %v1686_v24  ;;  %v1704_v30 = vcombine.high %v1670_v20, %v1686_v24 }
 0x5c0   : > { %v1886_v41 = vrot.slane %v5243_v61, %v1885_v26 }
 0x5c1   : > { %v1695_v32 = vrot.slane %v1687_v27, %v5085_v35  ;;  %v1702_v33 = vrot.slane %v1688_v28, %v5085_v35  ;;  %v1711_v34 = vrot.slane %v1703_v29, %v5085_v35  ;;  %v1718_v36 = vrot.slane %v1704_v30, %v5085_v35  ;;  %v4310_v28 = vld [vmem:[#allocation7] sm:$0xff]   ;;  %v4311_v29 = vld [vmem:[#allocation7 + $0x8] sm:$0xff]  }
 0x5c2   : > { %v5266_v27 = vrot.slane %v5042_v8, %v1885_v26  ;;  %4085 = vmatpush3.bf16.msra.mxu0 %v4310_v28 }
 0x5c3   : > { %v1723_v37 = vcombine.low %v1695_v32, %v1702_v33  ;;  %v3912_v38 = vcombine.high %v1695_v32, %v1702_v33  ;;  %v1739_v39 = vcombine.low %v1711_v34, %v1718_v36  ;;  %v3913_v40 = vcombine.high %v1711_v34, %v1718_v36  ;;  %4086 = vmatprep.subr.bf16.mxu0 %v4675_v0 }
 0x5c5   : > { %v1730_v42 = vrot.slane %v1723_v37, %v5074_v25  ;;  %v1738_v43 = vrot.slane %v3912_v38, %v5074_v25  ;;  %v1746_v11 = vrot.slane %v1739_v39, %v5074_v25  ;;  %v1754_v15 = vrot.slane %v3913_v40, %v5074_v25 }
 0x5c6   : > { %4087 = vmatpush3.bf16.msra.mxu0 %v4311_v29  ;;  %v1890_v40 = vsub.s32 2, %v5036_v6 }
 0x5c7   : > { %v1756_v44 = vcombine.high %v1730_v42, %v1738_v43  ;;  %v1772_v45 = vcombine.high %v1746_v11, %v1754_v15  ;;  %v1755_v46 = vcombine.low %v1730_v42, %v1738_v43  ;;  %v1771_v47 = vcombine.low %v1746_v11, %v1754_v15  ;;  %4100 = vmatprep.subr.bf16.mxu0 %v4675_v0 }
 0x5c8   : > { %v1891_v11 = vrot.slane %v5243_v61, %v1890_v40 }
 0x5c9   : > { %v1770_v50 = vrot.slane %v1756_v44, %v5085_v35  ;;  %v1786_v17 = vrot.slane %v1772_v45, %v5085_v35  ;;  %v1763_v16 = vrot.slane %v1755_v46, %v5085_v35  ;;  %v1779_v51 = vrot.slane %v1771_v47, %v5085_v35 }
 0x5cb   : > { %v1789_v52 = vcombine.low %v1770_v50, %v1786_v17  ;;  %v1788_v53 = vcombine.high %v1763_v16, %v1779_v51  ;;  %v1790_v54 = vcombine.high %v1770_v50, %v1786_v17  ;;  %v1787_v55 = vcombine.low %v1763_v16, %v1779_v51 }
 0x5cd   : > { %1796 = vrot.lane.b32.xlu1 %v1789_v52, %s5744_s16  ;;  %1792 = vrot.lane.b32.xlu0 %v1788_v53, %s5742_s1  ;;  %s5776_s1 = sld [smem:[#allocation31_spill]] }
 0x5d1   : > { %1800 = vrot.lane.b32.xlu1 %v1790_v54, %s5741_s22  ;;  %s3606_s22 = sand.u32 1, %s4804_s28  }
 0x5d3   : > { %s693_s16 = scalar_lea.vmem %s5776_s1, %s3964_s30  ;;  %s5574_s30 = sshll.u32 %s4804_s28, 7 }
 0x5d4   : > { %v704_v18 = vld [vmem:[%s693_s16] sm:$0xff]  ;;  %s5580_s27 = scalar_lea.hbm %s5782_s29, %s5574_s30  ;;  %s4688_s28 = smov [#allocation14]  }
 0x63f   : > { %v1797_v56 = vpop.permute.xlu1 %1796  ;;  %v1793_v57 = vpop.permute.xlu0 %1792 }
 0x640   : > { %v1803_v58 = vsel %vm1233_vm2, %v1787_v55, %v1793_v57 }
 0x641   : > { %v1805_v48 = vsel %vm1804_vm4, %v1803_v58, %v1797_v56 }
 0x643   : > { %v1801_v59 = vpop.permute.xlu1 %1800 }
 0x644   : > { %v1807_v60 = vsel %vm1806_vm5, %v1805_v48, %v1801_v59 }
 0x645   : > { %v1808_v49 = vpack.c.bf16 %v1807_v60, %v1807_v60 }
 0x647   : > { %4081 = vmatmul.mubr.msk.bf16.vlgmr.msra.gmra.mrb[20].mxu1 %vm735_vm1, %v1808_v49 }
 0x648   : > { %4096 = vmatprep.mubr.msk.bf16.mxu1 %vm4676_vm0, %v4675_v0  ;;  %4093 = vmatpush3.bf16.msra.mxu1 %v4308_v12 }
 0x649   : > { %4094 = vmatprep.subr.bf16.mxu1 %v4675_v0 }
 0x64c   : > { %4095 = vmatpush3.bf16.msra.mxu1 %v4309_v14 }
 0x64d   : > { %4106 = vmatprep.subr.bf16.mxu1 %v4675_v0 }
 0x71a   : > { %v1862_v63 = vpop.f32.mrb[20].mxu1 }
 0x71b   : > { %v1863_v1 = vadd.f32 %v1862_v63, %v1812_v62  ;;  %v4082_v2 = vpop.f32.mrb[21].mxu1 }
 0x71c   : > { %v1865_v4 = vpop.f32.mrb[22].mxu1 }
 0x71d   : > { %v4083_v5 = vpop.f32.mrb[23].mxu1  ;;  %v1868_v9 = vadd.f32 %v1863_v1, %v5027_v3  ;;  %v705_v3 = vld [vmem:[%s693_s16 + $0x8] sm:$0xff]  ;;  %s5781_s16 = sld [smem:[#allocation28_spill]] }
 0x71e   : > { %v1963_v19 = vpack.c.bf16 %v705_v3, %v704_v18 }
 0x71f   : > { %v1869_v10 = vsel %vm735_vm1, %v1868_v9, 0.0 }
 0x720   : > { %1870 = vadd.xlane.f32.xlu0 %v1869_v10  ;;  %4097 = vmatmul.mubr.msk.bf16.vlgmr.msra.gmra.mrb[24].mxu1 %vm735_vm1, %v1963_v19 }
 0x721   : > { %4108 = vmatprep.mubr.msk.bf16.mxu1 %vm4676_vm0, %v4675_v0 }
 0x723   : > { %p5783_p1 = scmp.ne.s32.totalorder %s5781_s16, 0 }
 0x736   : > { %1895 = vperm.xlu0 %4303, %v706_v13  }
 0x7ad   : > { %v1871_v20 = vpop.xlane.xlu0 %1870 }
 0x7ae   : > { %v1873_v21 = vmul.f32 0.03125, %v1871_v20 }
 0x7b0   : > { %v1874_v22 = vsub.f32 %v1868_v9, %v1873_v21 }
 0x7b2   : > { %v1875_v23 = vmul.f32 %v1874_v22, %v1874_v22 }
 0x7b4   : > { %v1876_v24 = vsel %vm735_vm1, %v1875_v23, 0.0 }
 0x7b5   : > { %1877 = vadd.xlane.f32.xlu1 %v1876_v24  ;;  %v5285_v44 = vpop.permute.xlu0 %1895 }
 0x7c6   : > { %1981 = vrot.lane.b32.xlu1 %v5266_v27, %s4679_s24 }
 0x7f3   : > { %v2021_v30 = vpop.f32.mrb[24].mxu1 }
 0x7f4   : > { %v4098_v31 = vpop.f32.mrb[25].mxu1 }
 0x7f5   : > { %v2024_v32 = vpop.f32.mrb[26].mxu1 }
 0x7f6   : > { %v4099_v33 = vpop.f32.mrb[27].mxu1 }
 0x842   : > { %v1878_v34 = vpop.xlane.xlu1 %1877 }
 0x843   : > { %v1879_v36 = vmul.f32 0.03125, %v1878_v34 }
 0x845   : > { %v1880_v37 = vadd.f32 1e-05, %v1879_v36 }
 0x846   : > { %v1982_v8 = vpop.permute.xlu1 %1981 }
 0x847   : > { %4336 = vrsqrt.f32 %v1880_v37  ;;  %v5272_v38 = vadd.f32 %v2021_v30, %v1982_v8  ;;  %v5276_v39 = vadd.f32 %v2024_v32, %v1982_v8 }
 0x849   : > { %2180 = vrot.lane.b32.xlu1 %v5272_v38, %s4678_s19 }
 0x84d   : > { %2182 = vrot.lane.b32.xlu1 %v5276_v39, %s4678_s19 }
 0x851   : > { %v4337_v42 = vpop.eup %4336  ;;  %2186 = vrot.lane.b32.xlu1 %v5272_v38, %s4680_s23 }
 0x852   : > { %v1882_v43 = vmul.f32 %v4337_v42, %v1874_v22 }
 0x854   : > { %v1887_v15 = vmul.f32 %v1886_v41, %v1882_v43 }
 0x855   : > { %2188 = vrot.lane.b32.xlu1 %v5276_v39, %s4680_s23 }
 0x856   : > { %v1892_v45 = vadd.f32 %v1891_v11, %v1887_v15 }
 0x858   : > { %v5290_v46 = vmul.f32 %v5285_v44, %v1892_v45 }
 0x859   : > { %2192 = vrot.lane.b32.xlu1 %v5272_v38, %s4677_s18 }
 0x85a   : > { %v1899_v47 = vpack.c.bf16 %v5290_v46, %v5290_v46 }
 0x85c   : > { %4089 = vmatmul.mubr.msk.bf16.vlgmr.msra.gmra.mrb[16].mxu0 %vm735_vm1, %v1899_v47 }
 0x85d   : > { %2194 = vrot.lane.b32.xlu1 %v5276_v39, %s4677_s18  ;;  %4102 = vmatprep.mubr.msk.bf16.mxu0 %vm4676_vm0, %v4675_v0 }
 0x8bb   : > { %v5301_v50 = vpop.permute.xlu1 %2180 }
 0x8bf   : > { %v5303_v17 = vpop.permute.xlu1 %2182 }
 0x8c3   : > { %v5305_v16 = vpop.permute.xlu1 %2186 }
 0x8c4   : > { %v2198_v52 = vcombine.low %v5272_v38, %v5305_v16  ;;  %v2199_v53 = vcombine.high %v5272_v38, %v5305_v16 }
 0x8c6   : > { %v2206_v55 = vrot.slane %v2198_v52, %v5074_v25  ;;  %v2213_v56 = vrot.slane %v2199_v53, %v5074_v25 }
 0x8c7   : > { %v5307_v51 = vpop.permute.xlu1 %2188 }
 0x8c8   : > { %v2266_v59 = vcombine.low %v5276_v39, %v5307_v51  ;;  %v2267_v48 = vcombine.high %v5276_v39, %v5307_v51 }
 0x8ca   : > { %v2274_v5 = vrot.slane %v2266_v59, %v5074_v25  ;;  %v2281_v9 = vrot.slane %v2267_v48, %v5074_v25 }
 0x8cb   : > { %v5313_v54 = vpop.permute.xlu1 %2192 }
 0x8cc   : > { %v2214_v57 = vcombine.low %v5301_v50, %v5313_v54  ;;  %v2215_v58 = vcombine.high %v5301_v50, %v5313_v54 }
 0x8ce   : > { %v2222_v60 = vrot.slane %v2214_v57, %v5074_v25  ;;  %v2229_v49 = vrot.slane %v2215_v58, %v5074_v25 }
 0x8cf   : > { %v5327_v62 = vpop.permute.xlu1 %2194 }
 0x8d0   : > { %v2230_v63 = vcombine.low %v2206_v55, %v2222_v60  ;;  %v2231_v1 = vcombine.high %v2206_v55, %v2222_v60  ;;  %v2246_v2 = vcombine.low %v2213_v56, %v2229_v49  ;;  %v2247_v4 = vcombine.high %v2213_v56, %v2229_v49 }
 0x8d1   : > { %v2282_v10 = vcombine.low %v5303_v17, %v5327_v62  ;;  %v2283_v12 = vcombine.high %v5303_v17, %v5327_v62 }
 0x8d2   : > { %v2238_v7 = vrot.slane %v2230_v63, %v5085_v35  ;;  %v2245_v13 = vrot.slane %v2231_v1, %v5085_v35  ;;  %v2254_v14 = vrot.slane %v2246_v2, %v5085_v35  ;;  %v2261_v18 = vrot.slane %v2247_v4, %v5085_v35 }
 0x8d3   : > { %v2290_v3 = vrot.slane %v2282_v10, %v5074_v25  ;;  %v2297_v19 = vrot.slane %v2283_v12, %v5074_v25 }
 0x8d4   : > { %v2334_v20 = vcombine.low %v2238_v7, %v2245_v13  ;;  %v3925_v21 = vcombine.high %v2238_v7, %v2245_v13  ;;  %v2350_v22 = vcombine.low %v2254_v14, %v2261_v18  ;;  %v3926_v23 = vcombine.high %v2254_v14, %v2261_v18 }
 0x8d5   : > { %v2298_v24 = vcombine.low %v2274_v5, %v2290_v3  ;;  %v2299_v26 = vcombine.high %v2274_v5, %v2290_v3  ;;  %v2314_v28 = vcombine.low %v2281_v9, %v2297_v19  ;;  %v2315_v29 = vcombine.high %v2281_v9, %v2297_v19 }
 0x8d6   : > { %v2341_v30 = vrot.slane %v2334_v20, %v5074_v25  ;;  %v2349_v31 = vrot.slane %v3925_v21, %v5074_v25  ;;  %v2357_v32 = vrot.slane %v2350_v22, %v5074_v25  ;;  %v2365_v33 = vrot.slane %v3926_v23, %v5074_v25 }
 0x8d7   : > { %v2306_v34 = vrot.slane %v2298_v24, %v5085_v35  ;;  %v2313_v36 = vrot.slane %v2299_v26, %v5085_v35  ;;  %v2322_v37 = vrot.slane %v2314_v28, %v5085_v35  ;;  %v2329_v8 = vrot.slane %v2315_v29, %v5085_v35 }
 0x8d8   : > { %v2366_v40 = vcombine.low %v2341_v30, %v2349_v31  ;;  %v2382_v41 = vcombine.low %v2357_v32, %v2365_v33  ;;  %v2367_v42 = vcombine.high %v2341_v30, %v2349_v31  ;;  %v2383_v43 = vcombine.high %v2357_v32, %v2365_v33 }
 0x8d9   : > { %v2402_v11 = vcombine.low %v2306_v34, %v2313_v36  ;;  %v3927_v15 = vcombine.high %v2306_v34, %v2313_v36  ;;  %v2418_v45 = vcombine.low %v2322_v37, %v2329_v8  ;;  %v3928_v47 = vcombine.high %v2322_v37, %v2329_v8 }
 0x8da   : > { %v2374_v52 = vrot.slane %v2366_v40, %v5085_v35  ;;  %v2390_v53 = vrot.slane %v2382_v41, %v5085_v35  ;;  %v2381_v55 = vrot.slane %v2367_v42, %v5085_v35  ;;  %v2397_v56 = vrot.slane %v2383_v43, %v5085_v35 }
 0x8db   : > { %v2409_v57 = vrot.slane %v2402_v11, %v5074_v25  ;;  %v2417_v58 = vrot.slane %v3927_v15, %v5074_v25  ;;  %v2425_v59 = vrot.slane %v2418_v45, %v5074_v25  ;;  %v2433_v48 = vrot.slane %v3928_v47, %v5074_v25 }
 0x8dc   : > { %v2400_v60 = vcombine.low %v2381_v55, %v2397_v56  ;;  %v2401_v49 = vcombine.high %v2381_v55, %v2397_v56  ;;  %v2398_v5 = vcombine.low %v2374_v52, %v2390_v53  ;;  %v2399_v9 = vcombine.high %v2374_v52, %v2390_v53 }
 0x8dd   : > { %v2434_v63 = vcombine.low %v2409_v57, %v2417_v58  ;;  %v2450_v1 = vcombine.low %v2425_v59, %v2433_v48  ;;  %v2435_v2 = vcombine.high %v2409_v57, %v2417_v58  ;;  %v2451_v4 = vcombine.high %v2425_v59, %v2433_v48 }
 0x8df   : > { %v2442_v10 = vrot.slane %v2434_v63, %v5085_v35  ;;  %v2458_v12 = vrot.slane %v2450_v1, %v5085_v35  ;;  %v2449_v7 = vrot.slane %v2435_v2, %v5085_v35  ;;  %v2465_v13 = vrot.slane %v2451_v4, %v5085_v35 }
 0x8e1   : > { %v2466_v14 = vcombine.low %v2442_v10, %v2458_v12  ;;  %v2467_v18 = vcombine.high %v2442_v10, %v2458_v12  ;;  %v2468_v3 = vcombine.low %v2449_v7, %v2465_v13  ;;  %v2469_v19 = vcombine.high %v2449_v7, %v2465_v13 }
 0x8e3   : > { %v2770_v20 = vpack.c.bf16 %v2466_v14, %v2398_v5  ;;  %v2771_v21 = vpack.c.bf16 %v2467_v18, %v2399_v9  ;;  %v2772_v22 = vpack.c.bf16 %v2468_v3, %v2400_v60  ;;  %v2773_v23 = vpack.c.bf16 %v2469_v19, %v2401_v49 }
 0x8e5   : > { %v2778_v24 = vsel %vm1233_vm2, %v2770_v20, 0  ;;  %v2824_v26 = vsel %vm1233_vm2, %v2771_v21, 0  ;;  %v2870_v18 = vsel %vm1233_vm2, %v2772_v22, 0  ;;  %v2916_v3 = vsel %vm1233_vm2, %v2773_v23, 0 }
 0x8e6   : > { %4101 = vmatpush3.bf16.xpose.msra.mxu0 %v2778_v24  ;;  %4107 = vmatpush3.bf16.xpose.msra.mxu1 %v2824_v26 }
 0x8e7   : > { %4112 = vmatprep.subr.bf16.mxu0 %v4675_v0  ;;  %4118 = vmatprep.subr.bf16.mxu1 %v4675_v0 }
 0x92f   : > { %v1957_v28 = vpop.f32.mrb[16].mxu0 }
 0x930   : > { %v1958_v29 = vadd.f32 %v1957_v28, %v5266_v27  ;;  %v4090_v30 = vpop.f32.mrb[17].mxu0 }
 0x931   : > { %v1960_v31 = vpop.f32.mrb[18].mxu0 }
 0x932   : > { %2033 = vrot.lane.b32.xlu0 %v1958_v29, %s4678_s19  ;;  %v4091_v32 = vpop.f32.mrb[19].mxu0  ;;  %2036 = vrot.lane.b32.xlu1 %v1958_v29, %s4680_s23  ;;  %s701_s19 = scalar_lea.vmem %s5709_s4, %s5021_s21  ;;  %s5456_s21 = scalar_lea.vmem [#allocation16], %s3888_s20 }
 0x933   : > { %v709_v22 = vld [vmem:[%s701_s19] sm:$0xff]  ;;  %s5778_s23 = smov 8   ;;  %s5779_s20 = smov 24  }
 0x934   : > { %v710_v23 = vmul.f32 -1e+30, %v709_v22  ;;  %s3652_s1 = sshll.u32 %s5456_s21, 4  ;;  %s4527_s19 = scalar_lea.vmem %s5583_s15, 512  ;;  %s5614_s1 = int_to_ptr.vmem [resolvable:$true] %s3652_s1 }
 0x935   : > { %p4528_p13 = scmp.ne.s32.totalorder %s5583_s15, %s4527_s19 }
 0x936   : > { %2039 = vrot.lane.b32.xlu0 %v1958_v29, %s4677_s18  ;;  %2472 = vrot.lane.b32.xlu1 %v5276_v39, %s4679_s24  ;;  %s5585_s18 = scalar_lea.sflag [#allocation15], %s3606_s22 }
 0x937   : > { %p4529_p6 = pnand %p4528_p13, %p5783_p1 }
 0x939   : > { %p4530_p9 = pneg %p4529_p6 }
 0x93a   : > { %2470 = vrot.lane.b32.xlu0 %v5272_v38, %s4679_s24  ;;  %2474 = vrot.lane.b32.xlu1 %v5301_v50, %s4679_s24 }
 0x93e   : > { %2476 = vrot.lane.b32.xlu0 %v5303_v17, %s4679_s24 }
 0x9a4   : > { %v2034_v27 = vpop.permute.xlu0 %2033  ;;  %v2037_v33 = vpop.permute.xlu1 %2036 }
 0x9a5   : > { %v2042_v34 = vcombine.low %v1958_v29, %v2037_v33  ;;  %v2043_v36 = vcombine.high %v1958_v29, %v2037_v33 }
 0x9a7   : > { %v2050_v41 = vrot.slane %v2042_v34, %v5074_v25  ;;  %v2057_v39 = vrot.slane %v2043_v36, %v5074_v25 }
 0x9a8   : > { %v2040_v37 = vpop.permute.xlu0 %2039 }
 0x9a9   : > { %v2058_v8 = vcombine.low %v2034_v27, %v2040_v37  ;;  %v2059_v40 = vcombine.high %v2034_v27, %v2040_v37 }
 0x9ab   : > { %v2066_v42 = vrot.slane %v2058_v8, %v5074_v25  ;;  %v2073_v38 = vrot.slane %v2059_v40, %v5074_v25 }
 0x9ad   : > { %v2074_v43 = vcombine.low %v2050_v41, %v2066_v42  ;;  %v2075_v50 = vcombine.high %v2050_v41, %v2066_v42  ;;  %v2090_v11 = vcombine.low %v2057_v39, %v2073_v38  ;;  %v2091_v15 = vcombine.high %v2057_v39, %v2073_v38 }
 0x9af   : > { %v2082_v17 = vrot.slane %v2074_v43, %v5085_v35  ;;  %v2089_v45 = vrot.slane %v2075_v50, %v5085_v35  ;;  %v2098_v47 = vrot.slane %v2090_v11, %v5085_v35  ;;  %v2105_v52 = vrot.slane %v2091_v15, %v5085_v35 }
 0x9b1   : > { %v2110_v53 = vcombine.low %v2082_v17, %v2089_v45  ;;  %v3923_v55 = vcombine.high %v2082_v17, %v2089_v45  ;;  %v2126_v56 = vcombine.low %v2098_v47, %v2105_v52  ;;  %v3924_v57 = vcombine.high %v2098_v47, %v2105_v52  ;;  %v2473_v52 = vpop.permute.xlu1 %2472 }
 0x9b3   : > { %v2117_v58 = vrot.slane %v2110_v53, %v5074_v25  ;;  %v2125_v59 = vrot.slane %v3923_v55, %v5074_v25  ;;  %v2133_v48 = vrot.slane %v2126_v56, %v5074_v25  ;;  %v2141_v60 = vrot.slane %v3924_v57, %v5074_v25  ;;  %v2471_v53 = vpop.permute.xlu0 %2470 }
 0x9b5   : > { %v2142_v49 = vcombine.low %v2117_v58, %v2125_v59  ;;  %v2158_v63 = vcombine.low %v2133_v48, %v2141_v60  ;;  %v2143_v1 = vcombine.high %v2117_v58, %v2125_v59  ;;  %v2159_v2 = vcombine.high %v2133_v48, %v2141_v60  ;;  %v2475_v56 = vpop.permute.xlu1 %2474 }
 0x9b7   : > { %v2150_v4 = vrot.slane %v2142_v49, %v5085_v35  ;;  %v2166_v5 = vrot.slane %v2158_v63, %v5085_v35  ;;  %v2157_v13 = vrot.slane %v2143_v1, %v5085_v35  ;;  %v2173_v14 = vrot.slane %v2159_v2, %v5085_v35  ;;  %v2477_v55 = vpop.permute.xlu0 %2476 }
 0x9b9   : > { %v2174_v9 = vcombine.low %v2150_v4, %v2166_v5  ;;  %v2175_v10 = vcombine.high %v2150_v4, %v2166_v5  ;;  %v2176_v19 = vcombine.low %v2157_v13, %v2173_v14  ;;  %v2177_v20 = vcombine.high %v2157_v13, %v2173_v14 }
 0x9bb   : > { %v2766_v12 = vpack.c.bf16 %v2174_v9, %v2174_v9  ;;  %v2767_v7 = vpack.c.bf16 %v2175_v10, %v2175_v10  ;;  %v2768_v21 = vpack.c.bf16 %v2176_v19, %v2176_v19  ;;  %v2769_v24 = vpack.c.bf16 %v2177_v20, %v2177_v20 }
 0x9bd   : > { %4103 = vmatmul.mubr.msk.bf16.vlgmr.msra.gmra.mrb[20].mxu0 %vm1233_vm2, %v2766_v12  ;;  %4109 = vmatmul.mubr.msk.bf16.vlgmr.msra.gmra.mrb[28].mxu1 %vm1233_vm2, %v2767_v7 }
 0x9be   : > { %4113 = vmatpush3.bf16.xpose.msra.mxu0 %v2870_v18  ;;  %4119 = vmatpush3.bf16.xpose.msra.mxu1 %v2916_v3 }
 0x9bf   : > { %4114 = vmatprep.mubr.msk.bf16.mxu0 %vm4676_vm0, %v4675_v0  ;;  %4120 = vmatprep.mubr.msk.bf16.mxu1 %vm4676_vm0, %v4675_v0 }
 0x9c0   : > { %4124 = vmatprep.subr.bf16.mxu0 %v4675_v0  ;;  %4130 = vmatprep.subr.bf16.mxu1 %v4675_v0 }
 0x9c5   : > { %4115 = vmatmul.mubr.msk.bf16.vlgmr.msra.gmra.mrb[24].mxu0 %vm1233_vm2, %v2768_v21  ;;  %4121 = vmatmul.mubr.msk.bf16.vlgmr.msra.gmra.mrb[32].mxu1 %vm1233_vm2, %v2769_v24 }
 0x9c6   : > { %4126 = vmatprep.mubr.msk.bf16.mxu0 %vm4676_vm0, %v4675_v0  ;;  %4132 = vmatprep.mubr.msk.bf16.mxu1 %vm4676_vm0, %v4675_v0 }
 0xa90   : > { %v2814_v26 = vpop.f32.mrb[20].mxu0  ;;  %v2860_v28 = vpop.f32.mrb[28].mxu1 }
 0xa91   : > { %v2815_v29 = vadd.f32 %v2814_v26, %v710_v23  ;;  %v2861_v30 = vadd.f32 %v2860_v28, %v710_v23  ;;  %v4104_v31 = vpop.f32.mrb[21].mxu0  ;;  %v4110_v32 = vpop.f32.mrb[29].mxu1 }
 0xa92   : > { %v2817_v27 = vpop.f32.mrb[22].mxu0  ;;  %v2863_v33 = vpop.f32.mrb[30].mxu1 }
 0xa93   : > { %v4105_v34 = vpop.f32.mrb[23].mxu0  ;;  %v4111_v36 = vpop.f32.mrb[31].mxu1  ;;  %v2958_v37 = vsel %vm1804_vm4, %v2815_v29, -inf  ;;  %v2961_v8 = vsel %vm1804_vm4, %v2861_v30, -inf }
 0xa94   : > { %2959 = vmax.xlane.f32.xlu1 %v2958_v37  ;;  %2962 = vmax.xlane.f32.xlu0 %v2961_v8 }
 0xa98   : > { %v2906_v40 = vpop.f32.mrb[24].mxu0  ;;  %v2952_v41 = vpop.f32.mrb[32].mxu1 }
 0xa99   : > { %v2907_v39 = vadd.f32 %v2906_v40, %v710_v23  ;;  %v2953_v42 = vadd.f32 %v2952_v41, %v710_v23  ;;  %v4116_v38 = vpop.f32.mrb[25].mxu0  ;;  %v4122_v43 = vpop.f32.mrb[33].mxu1 }
 0xa9a   : > { %v2909_v50 = vpop.f32.mrb[26].mxu0  ;;  %v2955_v11 = vpop.f32.mrb[34].mxu1 }
 0xa9b   : > { %v4117_v15 = vpop.f32.mrb[27].mxu0  ;;  %v4123_v17 = vpop.f32.mrb[35].mxu1  ;;  %v2964_v45 = vsel %vm1804_vm4, %v2907_v39, -inf  ;;  %v2967_v47 = vsel %vm1804_vm4, %v2953_v42, -inf }
 0xa9c   : > { %2965 = vmax.xlane.f32.xlu0 %v2964_v45  ;;  %2968 = vmax.xlane.f32.xlu1 %v2967_v47 }
 0xaad   : > { %2478 = vrot.lane.b32.xlu1 %v5305_v16, %s4679_s24 }
 0xab2   : > { %2480 = vrot.lane.b32.xlu0 %v5307_v51, %s4679_s24 }
 0xb21   : > { %v2960_v57 = vpop.xlane.xlu1 %2959  ;;  %v2963_v58 = vpop.xlane.xlu0 %2962 }
 0xb22   : > { %v2970_v59 = vsub.f32 %v2815_v29, %v2960_v57  ;;  %v2971_v48 = vsub.f32 %v2861_v30, %v2963_v58 }
 0xb24   : > { %v2974_v60 = vmul.f32 1.442695, %v2970_v59  ;;  %v2976_v49 = vmul.f32 1.442695, %v2971_v48 }
 0xb26   : > { %4338 = vpow2.f32 %v2974_v60 }
 0xb27   : > { %4340 = vpow2.f32 %v2976_v49 }
 0xb29   : > { %v2969_v2 = vpop.xlane.xlu1 %2968  ;;  %v2966_v4 = vpop.xlane.xlu0 %2965 }
 0xb2a   : > { %v2973_v5 = vsub.f32 %v2953_v42, %v2969_v2  ;;  %v2972_v9 = vsub.f32 %v2907_v39, %v2966_v4 }
 0xb2c   : > { %v2980_v10 = vmul.f32 1.442695, %v2973_v5  ;;  %v2978_v12 = vmul.f32 1.442695, %v2972_v9 }
 0xb2d   : > { %v2479_v18 = vpop.permute.xlu1 %2478 }
 0xb2e   : > { %4342 = vpow2.f32 %v2980_v10  ;;  %v2494_v24 = vcombine.low %v2471_v53, %v2479_v18  ;;  %v2495_v22 = vcombine.high %v2471_v53, %v2479_v18 }
 0xb2f   : > { %4344 = vpow2.f32 %v2978_v12 }
 0xb30   : > { %v4339_v63 = vpop.eup %4338  ;;  %v2502_v36 = vrot.slane %v2494_v24, %v5074_v25  ;;  %v2509_v37 = vrot.slane %v2495_v22, %v5074_v25 }
 0xb31   : > { %v5421_v1 = vpop.eup %4340  ;;  %v2982_v16 = vsel %vm1804_vm4, %v4339_v63, 0.0 }
 0xb32   : > { %2983 = vadd.xlane.f32.xlu0 %v2982_v16  ;;  %v2985_v51 = vsel %vm1804_vm4, %v5421_v1, 0.0 }
 0xb33   : > { %2986 = vadd.xlane.f32.xlu1 %v2985_v51 }
 0xb38   : > { %v5430_v7 = vpop.eup %4342 }
 0xb39   : > { %v5432_v13 = vpop.eup %4344  ;;  %v2991_v14 = vsel %vm1804_vm4, %v5430_v7, 0.0 }
 0xb44   : > { %2482 = vrot.lane.b32.xlu1 %v5313_v54, %s4679_s24  ;;  %v2988_v54 = vsel %vm1804_vm4, %v5432_v13, 0.0 }
 0xb48   : > { %2484 = vrot.lane.b32.xlu0 %v5327_v62, %s4679_s24  ;;  %v2481_v62 = vpop.permute.xlu0 %2480  ;;  %s5777_s24 = smov 16  }
 0xb49   : > { %v2562_v20 = vcombine.low %v2473_v52, %v2481_v62  ;;  %v2563_v21 = vcombine.high %v2473_v52, %v2481_v62 }
 0xb4b   : > { %v2570_v32 = vrot.slane %v2562_v20, %v5074_v25  ;;  %v2577_v27 = vrot.slane %v2563_v21, %v5074_v25 }
 0xb67   : > { %2992 = vadd.xlane.f32.xlu0 %v2991_v14 }
 0xb68   : > { %2989 = vadd.xlane.f32.xlu1 %v2988_v54 }
 0xbbf   : > { %v2984_v3 = vpop.xlane.xlu0 %2983 }
 0xbc0   : > { %4346 = vrcp.f32 %v2984_v3  ;;  %v2987_v19 = vpop.xlane.xlu1 %2986 }
 0xbc1   : > { %4348 = vrcp.f32 %v2987_v19 }
 0xbc3   : > { %v2485_v23 = vpop.permute.xlu0 %2484 }
 0xbc4   : > { %v2578_v26 = vcombine.low %v2477_v55, %v2485_v23  ;;  %v2579_v28 = vcombine.high %v2477_v55, %v2485_v23  ;;  %v2483_v29 = vpop.permute.xlu1 %2482 }
 0xbc5   : > { %v2510_v30 = vcombine.low %v2475_v56, %v2483_v29  ;;  %v2511_v31 = vcombine.high %v2475_v56, %v2483_v29 }
 0xbc6   : > { %v2586_v33 = vrot.slane %v2578_v26, %v5074_v25  ;;  %v2593_v34 = vrot.slane %v2579_v28, %v5074_v25 }
 0xbc7   : > { %v2518_v8 = vrot.slane %v2510_v30, %v5074_v25  ;;  %v2525_v40 = vrot.slane %v2511_v31, %v5074_v25 }
 0xbc8   : > { %v2594_v41 = vcombine.low %v2570_v32, %v2586_v33  ;;  %v2595_v39 = vcombine.high %v2570_v32, %v2586_v33  ;;  %v2610_v42 = vcombine.low %v2577_v27, %v2593_v34  ;;  %v2611_v38 = vcombine.high %v2577_v27, %v2593_v34 }
 0xbc9   : > { %v2526_v43 = vcombine.low %v2502_v36, %v2518_v8  ;;  %v2527_v50 = vcombine.high %v2502_v36, %v2518_v8  ;;  %v2542_v11 = vcombine.low %v2509_v37, %v2525_v40  ;;  %v2543_v15 = vcombine.high %v2509_v37, %v2525_v40 }
 0xbca   : > { %v4347_v17 = vpop.eup %4346  ;;  %v2602_v45 = vrot.slane %v2594_v41, %v5085_v35  ;;  %v2609_v47 = vrot.slane %v2595_v39, %v5085_v35  ;;  %v2618_v52 = vrot.slane %v2610_v42, %v5085_v35  ;;  %v2625_v53 = vrot.slane %v2611_v38, %v5085_v35 }
 0xbcb   : > { %v4349_v55 = vpop.eup %4348  ;;  %v2998_v56 = vmul.f32 %v4347_v17, %v4339_v63  ;;  %v2534_v57 = vrot.slane %v2526_v43, %v5085_v35  ;;  %v2541_v58 = vrot.slane %v2527_v50, %v5085_v35  ;;  %v2550_v59 = vrot.slane %v2542_v11, %v5085_v35 }
 0xbcc   : > { %v2999_v48 = vmul.f32 %v4349_v55, %v5421_v1  ;;  %v2698_v60 = vcombine.low %v2602_v45, %v2609_v47  ;;  %v3931_v49 = vcombine.high %v2602_v45, %v2609_v47  ;;  %v2714_v16 = vcombine.low %v2618_v52, %v2625_v53 }
 0xbcd   : > { %3597 = vst.msk [vmem:[%s5456_s21] sm:$0xff] %vm1804_vm4, %v2998_v56  ;;  %v3932_v51 = vcombine.high %v2618_v52, %v2625_v53  ;;  %v2557_v63 = vrot.slane %v2543_v15, %v5085_v35  ;;  %v2630_v2 = vcombine.low %v2534_v57, %v2541_v58  ;;  %v3929_v4 = vcombine.high %v2534_v57, %v2541_v58 }
 0xbce   : > { %3598 = vst.msk [vmem:[%s5456_s21 + $0x8] sm:$0xff] %vm1804_vm4, %v2999_v48  ;;  %v2705_v5 = vrot.slane %v2698_v60, %v5074_v25  ;;  %v2713_v1 = vrot.slane %v3931_v49, %v5074_v25  ;;  %v2721_v9 = vrot.slane %v2714_v16, %v5074_v25  ;;  %v3002_v15 = vpack.c.bf16 %v2998_v56, %v2998_v56 }
 0xbcf   : > { %v2729_v10 = vrot.slane %v3932_v51, %v5074_v25  ;;  %v2637_v12 = vrot.slane %v2630_v2, %v5074_v25  ;;  %v2645_v14 = vrot.slane %v3929_v4, %v5074_v25  ;;  %v2646_v54 = vcombine.low %v2550_v59, %v2557_v63 }
 0xbd0   : > { %v3930_v62 = vcombine.high %v2550_v59, %v2557_v63  ;;  %v2730_v18 = vcombine.low %v2705_v5, %v2713_v1  ;;  %v2731_v3 = vcombine.high %v2705_v5, %v2713_v1  ;;  %v3003_v17 = vpack.c.bf16 %v2999_v48, %v2999_v48 }
 0xbd1   : > { %v2653_v19 = vrot.slane %v2646_v54, %v5074_v25  ;;  %v2662_v20 = vcombine.low %v2637_v12, %v2645_v14  ;;  %v2746_v21 = vcombine.low %v2721_v9, %v2729_v10  ;;  %v2663_v24 = vcombine.high %v2637_v12, %v2645_v14 }
 0xbd2   : > { %v2661_v22 = vrot.slane %v3930_v62, %v5074_v25  ;;  %v2738_v23 = vrot.slane %v2730_v18, %v5085_v35  ;;  %v2747_v26 = vcombine.high %v2721_v9, %v2729_v10  ;;  %v2745_v27 = vrot.slane %v2731_v3, %v5085_v35 }
 0xbd3   : > { %v2754_v28 = vrot.slane %v2746_v21, %v5085_v35  ;;  %v2670_v29 = vrot.slane %v2662_v20, %v5085_v35  ;;  %v2677_v32 = vrot.slane %v2663_v24, %v5085_v35 }
 0xbd4   : > { %v2678_v30 = vcombine.low %v2653_v19, %v2661_v22  ;;  %v2679_v31 = vcombine.high %v2653_v19, %v2661_v22  ;;  %v2761_v33 = vrot.slane %v2747_v26, %v5085_v35 }
 0xbd5   : > { %v2762_v36 = vcombine.low %v2738_v23, %v2754_v28  ;;  %v2763_v37 = vcombine.high %v2738_v23, %v2754_v28 }
 0xbd6   : > { %v2686_v34 = vrot.slane %v2678_v30, %v5085_v35  ;;  %v2693_v8 = vrot.slane %v2679_v31, %v5085_v35  ;;  %v2764_v39 = vcombine.low %v2745_v27, %v2761_v33  ;;  %v2765_v42 = vcombine.high %v2745_v27, %v2761_v33  ;;  %v4312_v30 = vld [vmem:[#allocation10] sm:$0xff]  }
 0xbd8   : > { %v2694_v40 = vcombine.low %v2670_v29, %v2686_v34  ;;  %v2695_v41 = vcombine.high %v2670_v29, %v2686_v34  ;;  %v2696_v50 = vcombine.low %v2677_v32, %v2693_v8  ;;  %v2697_v11 = vcombine.high %v2677_v32, %v2693_v8 }
 0xbda   : > { %v3006_v38 = vpack.c.bf16 %v2762_v36, %v2694_v40  ;;  %v3007_v43 = vpack.c.bf16 %v2763_v37, %v2695_v41  ;;  %v3008_v45 = vpack.c.bf16 %v2764_v39, %v2696_v50  ;;  %v3009_v47 = vpack.c.bf16 %v2765_v42, %v2697_v11 }
 0xbdc   : > { %4125 = vmatpush3.bf16.msra.mxu0 %v3006_v38  ;;  %4131 = vmatpush3.bf16.msra.mxu1 %v3007_v43  ;;  %v4313_v38 = vld [vmem:[#allocation10 + $0x8] sm:$0xff]  }
 0xbdd   : > { %4136 = vmatprep.subr.bf16.mxu0 %v4675_v0  ;;  %4142 = vmatprep.subr.bf16.mxu1 %v4675_v0 }
 0xbdf   : > { %4127 = vmatmul.mubr.msk.bf16.vlgmr.msra.gmra.mrb[28].mxu0 %vm1804_vm4, %v3002_v15  ;;  %4133 = vmatmul.mubr.msk.bf16.vlgmr.msra.gmra.mrb[36].mxu1 %vm1804_vm4, %v3003_v17 }
 0xbe0   : > { %4137 = vmatpush3.bf16.msra.mxu0 %v3008_v45  ;;  %4143 = vmatpush3.bf16.msra.mxu1 %v3009_v47 }
 0xbe1   : > { %4138 = vmatprep.mubr.msk.bf16.mxu0 %vm4676_vm0, %v4675_v0  ;;  %4144 = vmatprep.mubr.msk.bf16.mxu1 %vm4676_vm0, %v4675_v0 }
 0xbe2   : > { %4148 = vmatprep.subr.bf16.mxu0 %v4675_v0  ;;  %4156 = vmatprep.subr.bf16.mxu1 %v4675_v0 }
 0xbf4   : > { %v2993_v52 = vpop.xlane.xlu0 %2992 }
 0xbf5   : > { %4350 = vrcp.f32 %v2993_v52  ;;  %v2990_v53 = vpop.xlane.xlu1 %2989 }
 0xbf6   : > { %4352 = vrcp.f32 %v2990_v53 }
 0xbff   : > { %v4351_v55 = vpop.eup %4350 }
 0xc00   : > { %v4353_v56 = vpop.eup %4352  ;;  %v3001_v57 = vmul.f32 %v4351_v55, %v5430_v7 }
 0xc01   : > { %v3000_v58 = vmul.f32 %v4353_v56, %v5432_v13 }
 0xc02   : > { %3600 = vst.msk [vmem:[%s5456_s21 + $0x18] sm:$0xff] %vm1804_vm4, %v3001_v57  ;;  %v3005_v59 = vpack.c.bf16 %v3001_v57, %v3001_v57 }
 0xc03   : > { %3599 = vst.msk [vmem:[%s5456_s21 + $0x10] sm:$0xff] %vm1804_vm4, %v3000_v58  ;;  %v3004_v48 = vpack.c.bf16 %v3000_v58, %v3000_v58 }
 0xc04   : > { %4145 = vmatmul.mubr.msk.bf16.vlgmr.msra.gmra.mrb[40].mxu1 %vm1804_vm4, %v3005_v59 }
 0xc05   : > { %4139 = vmatmul.mubr.msk.bf16.vlgmr.msra.gmra.mrb[32].mxu0 %vm1804_vm4, %v3004_v48  ;;  %4160 = vmatprep.mubr.msk.bf16.mxu1 %vm4676_vm0, %v4675_v0 }
 0xc06   : > { %4152 = vmatprep.mubr.msk.bf16.mxu0 %vm4676_vm0, %v4675_v0  ;;  %4149 = vmatpush3.bf16.msra.mxu0 %v4312_v30 }
 0xc07   : > { %4150 = vmatprep.subr.bf16.mxu0 %v4675_v0 }
 0xc0a   : > { %4151 = vmatpush3.bf16.msra.mxu0 %v4313_v38 }
 0xc0b   : > { %4164 = vmatprep.subr.bf16.mxu0 %v4675_v0 }
 0xcb2   : > { %v3047_v60 = vpop.f32.mrb[28].mxu0  ;;  %v3090_v7 = vpop.f32.mrb[36].mxu1 }
 0xcb3   : > { %v4128_v49 = vpop.f32.mrb[29].mxu0  ;;  %v4134_v13 = vpop.f32.mrb[37].mxu1 }
 0xcb4   : > { %v3050_v16 = vpop.f32.mrb[30].mxu0  ;;  %v3093_v51 = vpop.f32.mrb[38].mxu1  ;;  %v3336_v49 = vsub.s32 3, %v5036_v6 }
 0xcb5   : > { %v4129_v63 = vpop.f32.mrb[31].mxu0  ;;  %v4135_v2 = vpop.f32.mrb[39].mxu1 }
 0xcb6   : > { %v3337_v13 = vrot.slane %v5243_v61, %v3336_v49  ;;  %v4315_v61 = vld [vmem:[#allocation11 + $0x8] sm:$0xff]  }
 0xcd7   : > { %v3176_v4 = vpop.f32.mrb[40].mxu1 }
 0xcd8   : > { %v3133_v5 = vpop.f32.mrb[32].mxu0  ;;  %v3198_v1 = vcombine.low %v3090_v7, %v3176_v4  ;;  %v3199_v9 = vcombine.high %v3090_v7, %v3176_v4  ;;  %v4146_v10 = vpop.f32.mrb[41].mxu1 }
 0xcd9   : > { %v3182_v12 = vcombine.low %v3047_v60, %v3133_v5  ;;  %v3183_v14 = vcombine.high %v3047_v60, %v3133_v5  ;;  %v4140_v54 = vpop.f32.mrb[33].mxu0  ;;  %v3179_v62 = vpop.f32.mrb[42].mxu1 }
 0xcda   : > { %v3206_v18 = vrot.slane %v3198_v1, %v5074_v25  ;;  %v3213_v3 = vrot.slane %v3199_v9, %v5074_v25  ;;  %v3136_v19 = vpop.f32.mrb[34].mxu0  ;;  %v4147_v20 = vpop.f32.mrb[43].mxu1  ;;  %v4314_v62 = vld [vmem:[#allocation11] sm:$0xff]  }
 0xcdb   : > { %v3190_v21 = vrot.slane %v3182_v12, %v5074_v25  ;;  %v3197_v24 = vrot.slane %v3183_v14, %v5074_v25  ;;  %v4141_v22 = vpop.f32.mrb[35].mxu0  ;;  %4157 = vmatpush3.bf16.msra.mxu1 %v4314_v62 }
 0xcdc   : > { %4158 = vmatprep.subr.bf16.mxu1 %v4675_v0  ;;  %v5547_v22 = vld [vmem:[%s5718_s13] sm:$0xff] }
 0xcdd   : > { %v3214_v23 = vcombine.low %v3190_v21, %v3206_v18  ;;  %v3215_v26 = vcombine.high %v3190_v21, %v3206_v18  ;;  %v3230_v28 = vcombine.low %v3197_v24, %v3213_v3  ;;  %v3231_v29 = vcombine.high %v3197_v24, %v3213_v3  ;;  %v4317_v18 = vld [vmem:[%s5716_s11 + $0x8] sm:$0xff]  }
 0xcde   : > { %v3409_v21 = vsub.s32 4, %v5036_v6  ;;  %v3414_v24 = vsub.s32 5, %v5036_v6 }
 0xcdf   : > { %v3222_v31 = vrot.slane %v3214_v23, %v5085_v35  ;;  %v3229_v32 = vrot.slane %v3215_v26, %v5085_v35  ;;  %v3238_v27 = vrot.slane %v3230_v28, %v5085_v35  ;;  %v3245_v33 = vrot.slane %v3231_v29, %v5085_v35  ;;  %4159 = vmatpush3.bf16.msra.mxu1 %v4315_v61 }
 0xce0   : > { %v3410_v23 = vrot.slane %v5547_v22, %v3409_v21  ;;  %v3415_v28 = vrot.slane %v5547_v22, %v3414_v24 }
 0xce1   : > { %v3250_v34 = vcombine.low %v3222_v31, %v3229_v32  ;;  %v3941_v36 = vcombine.high %v3222_v31, %v3229_v32  ;;  %v3266_v37 = vcombine.low %v3238_v27, %v3245_v33  ;;  %v3942_v8 = vcombine.high %v3238_v27, %v3245_v33  ;;  %v4318_v33 = vld [vmem:[%s5716_s11 + $0x10] sm:$0xff]  }
 0xce3   : > { %v3257_v40 = vrot.slane %v3250_v34, %v5074_v25  ;;  %v3265_v41 = vrot.slane %v3941_v36, %v5074_v25  ;;  %v3273_v39 = vrot.slane %v3266_v37, %v5074_v25  ;;  %v3281_v42 = vrot.slane %v3942_v8, %v5074_v25  ;;  %v4319_v34 = vld [vmem:[%s5716_s11 + $0x18] sm:$0xff]  }
 0xce5   : > { %v3283_v43 = vcombine.high %v3257_v40, %v3265_v41  ;;  %v3299_v50 = vcombine.high %v3273_v39, %v3281_v42  ;;  %v3282_v11 = vcombine.low %v3257_v40, %v3265_v41  ;;  %v3298_v15 = vcombine.low %v3273_v39, %v3281_v42 }
 0xce7   : > { %v3297_v17 = vrot.slane %v3283_v43, %v5085_v35  ;;  %v3313_v45 = vrot.slane %v3299_v50, %v5085_v35  ;;  %v3290_v47 = vrot.slane %v3282_v11, %v5085_v35  ;;  %v3306_v52 = vrot.slane %v3298_v15, %v5085_v35 }
 0xce9   : > { %v3316_v53 = vcombine.low %v3297_v17, %v3313_v45  ;;  %v3315_v55 = vcombine.high %v3290_v47, %v3306_v52  ;;  %v3317_v56 = vcombine.high %v3297_v17, %v3313_v45  ;;  %v3314_v25 = vcombine.low %v3290_v47, %v3306_v52 }
 0xceb   : > { %3323 = vrot.lane.b32.xlu1 %v3316_v53, %s5777_s24  ;;  %3319 = vrot.lane.b32.xlu0 %v3315_v55, %s5778_s23  ;;  %s4531_s24 = sshll.u32 %s4688_s28, 4  ;;  %s4532_s24 = int_to_ptr.vmem [resolvable:$false] %s4531_s24 }
 0xcec   : > { %p4534_p5 = scmp.lt.s32.totalorder %s5583_s15, %s4532_s24 }
 0xcef   : > { %3327 = vrot.lane.b32.xlu1 %v3317_v56, %s5779_s20  ;;  %s5780_s20 = sld [smem:[#allocation33_spill]] }
 0xcf5   : > { %v3946_v36 = vld [vmem:[%s5780_s20] ss:$0 sm:$0xff]  ;;  %s4533_s20 = scalar_lea.vmem %s4532_s24, 1024 }
 0xcf6   : > { %p4535_p0 = scmp.lt.s32.totalorder %s4533_s20, %s4527_s19 }
 0xcf8   : > { %p4536_p10 = por %p4535_p0, %p4534_p5 }
 0xcfa   : > { %p4537_p2 = pnand %p4536_p10, %p4530_p9 }
 0xd5d   : > { %v3324_v57 = vpop.permute.xlu1 %3323  ;;  %v3320_v58 = vpop.permute.xlu0 %3319 }
 0xd5e   : > { %v3330_v59 = vsel %vm1233_vm2, %v3314_v25, %v3320_v58 }
 0xd5f   : > { %v3331_v60 = vsel %vm1804_vm4, %v3330_v59, %v3324_v57 }
 0xd61   : > { %v3328_v48 = vpop.permute.xlu1 %3327 }
 0xd62   : > { %v3332_v7 = vsel %vm1806_vm5, %v3331_v60, %v3328_v48 }
 0xd63   : > { %v3333_v35 = vpack.c.bf16 %v3332_v7, %v3332_v7 }
 0xd65   : > { %4153 = vmatmul.mubr.msk.bf16.vlgmr.msra.gmra.mrb[36].mxu0 %vm735_vm1, %v3333_v35 }
 0xd66   : > { %4172 = vmatprep.mubr.msk.bf16.mxu0 %vm4676_vm0, %v4675_v0 }
 0xe38   : > { %v3387_v16 = vpop.f32.mrb[36].mxu0 }
 0xe39   : > { %v3388_v51 = vadd.f32 %v3387_v16, %v3337_v13  ;;  %v4154_v63 = vpop.f32.mrb[37].mxu0 }
 0xe3a   : > { %v3390_v2 = vpop.f32.mrb[38].mxu0 }
 0xe3b   : > { %v4155_v4 = vpop.f32.mrb[39].mxu0  ;;  %v3393_v5 = vadd.f32 %v3388_v51, %v5290_v46  ;;  %v4316_v46 = vld [vmem:[%s5716_s11] sm:$0xff]  }
 0xe3c   : > { %4165 = vmatpush3.bf16.msra.mxu0 %v4316_v46 }
 0xe3d   : > { %v3394_v1 = vsel %vm735_vm1, %v3393_v5, 0.0  ;;  %4166 = vmatprep.subr.bf16.mxu0 %v4675_v0 }
 0xe3e   : > { %3395 = vadd.xlane.f32.xlu0 %v3394_v1 }
 0xe40   : > { %4167 = vmatpush3.bf16.msra.mxu0 %v4317_v18 }
 0xe41   : > { %4168 = vmatprep.subr.bf16.mxu0 %v4675_v0 }
 0xe44   : > { %4169 = vmatpush3.bf16.msra.mxu0 %v4318_v33 }
 0xe45   : > { %4170 = vmatprep.subr.bf16.mxu0 %v4675_v0  ;;  %v3497_v0 = vsub.s32 6, %v5036_v6 }
 0xe47   : > { %v3498_v43 = vrot.slane %v5547_v22, %v3497_v0 }
 0xe48   : > { %4171 = vmatpush3.bf16.msra.mxu0 %v4319_v34 }
 0xecb   : > { %v3396_v9 = vpop.xlane.xlu0 %3395 }
 0xecc   : > { %v3397_v10 = vmul.f32 0.03125, %v3396_v9 }
 0xece   : > { %v3398_v12 = vsub.f32 %v3393_v5, %v3397_v10 }
 0xed0   : > { %v3399_v14 = vmul.f32 %v3398_v12, %v3398_v12 }
 0xed2   : > { %v3400_v54 = vsel %vm735_vm1, %v3399_v14, 0.0 }
 0xed3   : > { %3401 = vadd.xlane.f32.xlu1 %v3400_v54 }
 0xf60   : > { %v3402_v3 = vpop.xlane.xlu1 %3401 }
 0xf61   : > { %v3403_v19 = vmul.f32 0.03125, %v3402_v3 }
 0xf63   : > { %v3404_v20 = vadd.f32 1e-05, %v3403_v19 }
 0xf65   : > { %4354 = vrsqrt.f32 %v3404_v20 }
 0xf6f   : > { %v4355_v26 = vpop.eup %4354 }
 0xf70   : > { %v3406_v29 = vmul.f32 %v4355_v26, %v3398_v12 }
 0xf72   : > { %v3411_v30 = vmul.f32 %v3410_v23, %v3406_v29 }
 0xf74   : > { %v3416_v31 = vadd.f32 %v3415_v28, %v3411_v30 }
 0xf76   : > { %v3417_v32 = vmul.f32 %v3416_v31, %v5285_v44 }
 0xf78   : > { %v3418_v27 = vpack.c.bf16 %v3417_v32, %v3417_v32 }
 0xf7a   : > { %4161 = vmatmul.mubr.msk.bf16.vlgmr.msra.gmra.mrb[44].mxu1 %vm735_vm1, %v3418_v27 }
0x104d   : > { %v3479_v37 = vpop.f32.mrb[44].mxu1 }
0x104e   : > { %v3480_v8 = vadd.f32 %v3946_v36, %v3479_v37  ;;  %v4162_v40 = vpop.f32.mrb[45].mxu1 }
0x104f   : > { %v3482_v41 = vpop.f32.mrb[46].mxu1 }
0x1050   : > { %v3485_v39 = vmax.f32 %v3480_v8, 0.0  ;;  %v4163_v42 = vpop.f32.mrb[47].mxu1 }
0x1052   : > { %v3486_v38 = vpack.c.bf16 %v3485_v39, %v3485_v39 }
0x1054   : > { %4173 = vmatmul.mubr.msk.bf16.vlgmr.msra.gmra.mrb[40].mxu0 %vm3523_vm6, %v3486_v38 }
0x1127   : > { %v3561_v50 = vpop.f32.mrb[40].mxu0 }
0x1128   : > { %v3562_v11 = vadd.f32 %v3561_v50, %v3498_v43  ;;  %v4174_v15 = vpop.f32.mrb[41].mxu0 }
0x1129   : > { %v3564_v17 = vpop.f32.mrb[42].mxu0 }
0x112a   : > { %v4175_v45 = vpop.f32.mrb[43].mxu0  ;;  %v3567_v47 = vadd.f32 %v3562_v11, %v3417_v32 }
0x112c   : > { %v3568_v52 = vsel %vm735_vm1, %v3567_v47, 0.0 }
0x112d   : > { %3569 = vadd.xlane.f32.xlu0 %v3568_v52 }
0x11ba   : > { %v3570_v53 = vpop.xlane.xlu0 %3569 }
0x11bb   : > { %v3571_v55 = vmul.f32 0.03125, %v3570_v53 }
0x11bd   : > { %v5566_v56 = vsub.f32 %v3567_v47, %v3571_v55 }
0x11bf   : > { %v3573_v25 = vmul.f32 %v5566_v56, %v5566_v56 }
0x11c1   : > { %v3574_v57 = vsel %vm735_vm1, %v3573_v25, 0.0 }
0x11c2   : > { %3575 = vadd.xlane.f32.xlu0 %v3574_v57 }
0x11c3   : > { %4540 = shalt.err (!%p4537_p2)
}
0x11c4   : > { %s4541_s17 = scalar_lea.hbm %s5580_s27, 512  ;;  %s4545_s14 = scalar_lea.hbm %s5782_s29, 1024 }
0x11c5   : > { %p4542_p3 = scmp.ne.s32.totalorder %s5580_s27, %s4541_s17  ;;  %p4546_p7 = scmp.lt.u32.totalorder %s5580_s27, %s5782_s29 }
0x11c6   : > { %p4547_p8 = scmp.lt.u32.totalorder %s4545_s14, %s4541_s17  ;;  %p4549_p13 = scmp.lt.u32.totalorder %s4541_s17, %s5580_s27 }
0x11c7   : > { %p4543_p4 = pnand %p4542_p3, %p5783_p1 }
0x11c8   : > { %p4548_p11 = por %p4547_p8, %p4546_p7 }
0x11c9   : > { %p4544_p12 = pneg %p4543_p4 }
0x11ca   : > { %p4550_p6 = por %p4549_p13, %p4548_p11 }
0x11cc   : > { %p4551_p9 = pnand %p4550_p6, %p4544_p12 }
0x11ce   : > { %4554 = shalt.err (!%p4551_p9)
}
0x11cf   : > { %s4689_s19 = smov 128   ;;  %s4690_s20 = smov 256  }
0x11d0   : > { %4201 = dma.vmem_to_hbm [thread:$0]  (%p5783_p1), %s5583_s15, 512, %s5580_s27, %s5585_s18, %s4689_s19, %s4690_s20, %s5778_s23  }
0x11d1   : > { %s5784_s0 = sld [smem:[#allocation36_spill]]  ;;  %s4555_s28 = scalar_lea.vmem %s5614_s1, 512 }
0x11d2   : > { %p4556_p5 = scmp.ne.s32.totalorder %s5614_s1, %s4555_s28  ;;  %s4691_s24 = smov [#allocation16]  }
0x11d3   : > { %s4559_s2 = sshll.u32 %s4691_s24, 4  ;;  %s4560_s2 = int_to_ptr.vmem [resolvable:$false] %s4559_s2 }
0x11d4   : > { %p4557_p0 = pnand %p4556_p5, %p5783_p1  ;;  %s4561_s27 = scalar_lea.vmem %s4560_s2, 1024 }
0x11d5   : > { %p4562_p2 = scmp.lt.s32.totalorder %s5614_s1, %s4560_s2  ;;  %p4563_p3 = scmp.lt.s32.totalorder %s4561_s27, %s4555_s28 }
0x11d6   : > { %p4558_p10 = pneg %p4557_p0 }
0x11d7   : > { %s5620_s14 = scalar_lea.hbm %s5784_s0, %s5574_s30  ;;  %p4564_p4 = por %p4563_p3, %p4562_p2 }
0x11d9   : > { %p4565_p12 = pnand %p4564_p4, %p4558_p10 }
0x11db   : > { %4568 = shalt.err (!%p4565_p12)
}
0x11dc   : > { %s4569_s21 = scalar_lea.hbm %s5620_s14, 512  ;;  %s4573_s22 = scalar_lea.hbm %s5784_s0, 1024 }
0x11dd   : > { %p4570_p7 = scmp.ne.s32.totalorder %s5620_s14, %s4569_s21  ;;  %p4574_p13 = scmp.lt.u32.totalorder %s5620_s14, %s5784_s0 }
0x11de   : > { %p4575_p6 = scmp.lt.u32.totalorder %s4573_s22, %s4569_s21  ;;  %p4577_p5 = scmp.lt.u32.totalorder %s4569_s21, %s5620_s14 }
0x11df   : > { %p4571_p8 = pnand %p4570_p7, %p5783_p1 }
0x11e0   : > { %p4576_p9 = por %p4575_p6, %p4574_p13 }
0x11e1   : > { %p4572_p11 = pneg %p4571_p8 }
0x11e2   : > { %p4578_p0 = por %p4577_p5, %p4576_p9 }
0x11e4   : > { %p4579_p10 = pnand %p4578_p0, %p4572_p11 }
0x11e6   : > { %4582 = shalt.err (!%p4579_p10)
}
0x11e7   : > { %4202 = dma.vmem_to_hbm [thread:$0]  (%p5783_p1), %s5614_s1, 512, %s5620_s14, %s5585_s18, %s4689_s19, %s4690_s20, %s5778_s23   ;;  %v3583_v60 = vsub.s32 7, %v5036_v6 }
0x11e8   : > { %s3887_s28 = sshll.u32 %s5154_s26, 3  ;;  %v3955_v13 = vld [vmem:[%s5718_s13 + $0x8] ss:$0 sm:$0xff]  ;;  %s5785_s20 = sld [smem:[#allocation34_spill]] }
0x11e9   : > { %v3584_v7 = vrot.slane %v5547_v22, %v3583_v60  ;;  %s670_s23 = scalar_lea.vmem [#allocation13], %s3887_s28  ;;  %s3602_s15 = scalar_lea.sflag [#allocation4], %s5154_s26 }
0x11ea   : > { %s3625_s1 = sshll.u32 %s670_s23, 4  ;;  %s4692_s22 = smov [#allocation13]   ;;  %s5661_s1 = int_to_ptr.vmem [resolvable:$true] %s3625_s1 }
0x11eb   : > { %s4583_s17 = scalar_lea.vmem %s5661_s1, 128  ;;  %s4587_s24 = sshll.u32 %s4692_s22, 4  ;;  %s4588_s24 = int_to_ptr.vmem [resolvable:$false] %s4587_s24 }
0x11ec   : > { %p4584_p2 = scmp.ne.s32.totalorder %s5661_s1, %s4583_s17  ;;  %s4589_s2 = scalar_lea.vmem %s4588_s24, 256 }
0x11ed   : > { %p4590_p12 = scmp.lt.s32.totalorder %s5661_s1, %s4588_s24  ;;  %p4591_p7 = scmp.lt.s32.totalorder %s4589_s2, %s4583_s17 }
0x11ee   : > { %s5659_s14 = scalar_lea.hbm %s5785_s20, %s5574_s30  ;;  %p4585_p3 = pnand %p4584_p2, %p5783_p1 }
0x11ef   : > { %p4592_p8 = por %p4591_p7, %p4590_p12 }
0x11f0   : > { %p4586_p4 = pneg %p4585_p3 }
0x11f2   : > { %p4593_p11 = pnand %p4592_p8, %p4586_p4 }
0x124f   : > { %v3576_v58 = vpop.xlane.xlu0 %3575 }
0x1250   : > { %v3577_v59 = vmul.f32 0.03125, %v3576_v58 }
0x1252   : > { %v3578_v48 = vadd.f32 1e-05, %v3577_v59 }
0x1254   : > { %4356 = vrsqrt.f32 %v3578_v48 }
0x125e   : > { %v4357_v35 = vpop.eup %4356 }
0x125f   : > { %v3580_v49 = vmul.f32 %v4357_v35, %v5566_v56 }
0x1261   : > { %v3585_v16 = vmul.f32 %v3584_v7, %v3580_v49 }
0x1263   : > { %v3590_v51 = vadd.f32 %v3955_v13, %v3585_v16 }
0x1265   : > { %v3591_v63 = vmul.f32 %v3590_v51, %v5285_v44 }
0x1267   : > { %3592 = vst.msk [vmem:[%s670_s23] sm:$0xff] %vm735_vm1, %v3591_v63 }
0x1268   : > { %4596 = shalt.err (!%p4593_p11)
}
0x1269   : > { %s4597_s26 = scalar_lea.hbm %s5659_s14, 128  ;;  %s4601_s27 = scalar_lea.hbm %s5785_s20, 256 }
0x126a   : > { %p4598_p13 = scmp.ne.s32.totalorder %s5659_s14, %s4597_s26  ;;  %p4602_p5 = scmp.lt.u32.totalorder %s5659_s14, %s5785_s20 }
0x126b   : > { %p4603_p0 = scmp.lt.u32.totalorder %s4601_s27, %s4597_s26  ;;  %p4605_p2 = scmp.lt.u32.totalorder %s4597_s26, %s5659_s14 }
0x126c   : > { %p4599_p6 = pnand %p4598_p13, %p5783_p1 }
0x126d   : > { %p4604_p10 = por %p4603_p0, %p4602_p5 }
0x126e   : > { %p4600_p9 = pneg %p4599_p6 }
0x126f   : > { %p4606_p3 = por %p4605_p2, %p4604_p10 }
0x1271   : > { %p4607_p4 = pnand %p4606_p3, %p4600_p9 }
0x1273   : > { %4610 = shalt.err (!%p4607_p4)
}
0x1274   : > { %4200 = dma.vmem_to_hbm [thread:$0]  (%p5783_p1), %s5661_s1, 128, %s5659_s14, %s3602_s15  }
0x1275 PF: > { %s5786_s18 = sld [smem:[#allocation25_spill]]  ;;  %s5787_s19 = sld [smem:[#allocation23_spill]] }
0x1276   : > { %s5788_s17 = sld [smem:[#allocation29_spill]] }
0x127b   : > { %p4247_p12 = scmp.ge.s32.totalorder %s5786_s18, 2  ;;  %s3667_s22 = sand.u32 1, %s5787_s19  }
0x127c   : > { %p5789_p7 = scmp.ne.s32.totalorder %s5788_s17, 0  ;;  %s3668_s24 = scalar_lea.sflag [#allocation4], %s3667_s22 }
0x127e   : > { %p4226_p8 = pnand %p4247_p12, %p5789_p7 }
0x1280   : > { %4644 = dma.done.wait (!%p4226_p8), %s3668_s24, 128  }
0x1281   : > { %4646 = vsyncadd (!%p4226_p8), %s3668_s24, 4294967168  ;;  %s5790_s2 = sadd.s32 4294967294, %s5786_s18  }
0x1282   : > { %s3676_s26 = sand.u32 1, %s5790_s2  }
0x1283   : > { %s3677_s30 = scalar_lea.sflag [#allocation15], %s3676_s26 }
0x1284   : > { %4648 = dma.done.wait (!%p4226_p8), %s3677_s30, 1024  }
0x1285   : > { %4650 = vsyncadd (!%p4226_p8), %s3677_s30, 4294966272  ;;  %s5791_s27 = sld [smem:[#allocation26_spill]]  ;;  %s5792_s16 = sld [smem:[#allocation24_spill]] }
0x1286   : > { %s5793_s26 = sld [smem:[#allocation27_spill]]  ;;  %s5794_s24 = smov %s4657_s25 }
0x128b   : > { %p35_p1 = scmp.ge.s32.totalorder %s5791_s27, 4   ;;  %s5795_s25 = smov %s5792_s16 }
0x128d   :  { %37 = sbr.rel (!%p35_p1) target bundleno = 17 (0x11), region = 181 }
0x1294   :  { %3691 = vsyncpa [#allocation3], 1 }
0x1295   :  { %3693 = vsyncpa [#allocation3 + $0x1], 1 }
0x1296   :  { %3694 = vsyncpa [#allocation6], 1 }
0x1297   :  { %3695 = vsyncpa [#allocation9], 1 }
0x1298   :  { %3696 = vsyncpa [#allocation12], 1 }
0x1299   :  { %3697 = vsyncpa [#allocation4], 1 }
0x129a   :  { %3699 = vsyncpa [#allocation4 + $0x1], 1 }
0x129b   :  { %3700 = vsyncpa [#allocation15], 1 }
0x129c   :  { %3702 = vsyncpa [#allocation15 + $0x1], 1 }

</bundles_post_ra>
